<compile_context>
chip_gen: v7x
topology: tpu7x:2x2x1
jax: 0.10.0
libtpu: 0.0.40
codegen_flags: <defaults>
</compile_context>

<pallas_src>
import functools
import numpy as np
import jax
import jax.numpy as jnp
from jax.experimental import pallas as pl
from jax.experimental.pallas import tpu as pltpu

MAX_DEG = 10
MIN_DEG = 0
NUM_DEG = MAX_DEG + 1 - MIN_DEG   # 11 degree buckets
LANE = 128
C_PAD = 128                       # conv output channels, lane-padded (actual 64)


def _ceil_to(n, m):
    return max(m, ((n + m - 1) // m) * m)


# --------------------------------------------------------------------------
# Kernel 1: fused GraphConv (+ optional GraphPool of its own input), single
# grid step.  One adjacency matmul for the neighbor sum, one wide
# K-concatenated matmul against all degrees' weights, one per-atom degree
# select, ReLU, bf16 lane-dense store.
# --------------------------------------------------------------------------
def _fused_conv_kernel(x_ref, adj_ref, deg_ref, w_ref, b_ref, o_ref, *,
                       num_deg, c_pad, pool_input):
    if pool_input:
        # GraphPool of the previous layer's output: max over {self, neighbors}
        x = x_ref[0]                                    # [n_pad, C_PAD] bf16
        for k in range(1, x_ref.shape[0]):              # static unroll, <= MAX_DEG
            x = jnp.maximum(x, x_ref[k])
    else:
        x = x_ref[...].astype(jnp.bfloat16)             # [n_pad, F_pad]

    # neighbor sum for every atom at once: adj @ x on the MXU
    rel = jnp.dot(adj_ref[...], x, preferred_element_type=jnp.float32)
    cat = jnp.concatenate([rel.astype(jnp.bfloat16), x], axis=-1)   # [n_pad, 2F]

    # one wide matmul against all degrees' [rel; self] weight blocks
    y = jnp.dot(cat, w_ref[...], preferred_element_type=jnp.float32) + b_ref[...]

    # per-atom degree select (atoms are already degree-sorted; padded atoms
    # have deg = -1 and stay 0)
    deg = deg_ref[...]                                   # [n_pad, 1] int32
    out = jnp.zeros(o_ref.shape, jnp.float32)
    for d in range(num_deg):
        out = jnp.where(deg == d, y[:, d * c_pad:(d + 1) * c_pad], out)

    o_ref[...] = jnp.maximum(out, 0.0).astype(jnp.bfloat16)


def fused_graph_conv(x, adj, deg_col, w_big, b_big, *, pool_input):
    n_pad = adj.shape[0]
    ndc = w_big.shape[1]
    c_pad = ndc // NUM_DEG
    if pool_input:
        k, _, f_vis = x.shape
        x_spec = pl.BlockSpec((k, n_pad, f_vis), lambda i: (0, 0, 0))
    else:
        f_vis = x.shape[1]
        x_spec = pl.BlockSpec((n_pad, f_vis), lambda i: (0, 0))
    return pl.pallas_call(
        functools.partial(_fused_conv_kernel, num_deg=NUM_DEG, c_pad=c_pad,
                          pool_input=pool_input),
        out_shape=jax.ShapeDtypeStruct((n_pad, c_pad), jnp.bfloat16),
        grid=(1,),
        in_specs=[
            x_spec,
            pl.BlockSpec((n_pad, n_pad), lambda i: (0, 0)),
            pl.BlockSpec((n_pad, 1), lambda i: (0, 0)),
            pl.BlockSpec((2 * f_vis, ndc), lambda i: (0, 0)),
            pl.BlockSpec((1, ndc), lambda i: (0, 0)),
        ],
        out_specs=pl.BlockSpec((n_pad, c_pad), lambda i: (0, 0)),
        compiler_params=pltpu.CompilerParams(dimension_semantics=("arbitrary",)),
    )(x, adj, deg_col, w_big, b_big)


# --------------------------------------------------------------------------
# Kernel 2: final GraphPool + atom dense (ReLU) + GraphGather (segment sum via
# one-hot matmul, streamed per-segment masked max, tanh) + classification head
# + grouped softmax — all fused.  Outputs are lane-dense [B_pad, 128/256].
# --------------------------------------------------------------------------
def _tail_kernel(g_ref, wd_ref, bd_ref, onehot_ref, memb_ref, wo_ref, bo_ref,
                 gsum_ref, probs_ref, logits_ref, fp_ref, *, n_valid_out):
    # GraphPool: max over {self, neighbors} (row 0 of g is self)
    x = g_ref[0]
    for k in range(1, g_ref.shape[0]):
        x = jnp.maximum(x, g_ref[k])                     # bf16 [n_pad, C_PAD]

    # atom-level dense + ReLU
    dense = jnp.dot(x, wd_ref[...], preferred_element_type=jnp.float32) + bd_ref[...]
    dense = jnp.maximum(dense, 0.0)                      # [n_pad, D] f32
    dense_b = dense.astype(jnp.bfloat16)

    # GraphGather segment sum == one-hot(membership) @ dense  (MXU)
    sums = jnp.dot(onehot_ref[...], dense_b, preferred_element_type=jnp.float32)

    # GraphGather segment max: per-segment masked reduce over [n_pad, D]
    # (no [B, N, D] broadcast).  dense >= 0 after ReLU, so the 0 sentinel is
    # exact for non-empty segments.
    # TODO(synk): truly empty segments yield 0 here (reference gives -inf);
    # such rows are trimmed away downstream.
    memb = memb_ref[...]                                 # [n_pad, 1] int32
    maxs_rows = []
    for b in range(onehot_ref.shape[0]):                 # static, b_pad small
        m = memb == b
        maxs_rows.append(jnp.max(jnp.where(m, dense, 0.0), axis=0, keepdims=True))
    maxs = jnp.concatenate(maxs_rows, axis=0)            # [b_pad, D]

    fp = jnp.tanh(jnp.concatenate([sums, maxs], axis=-1))  # [b_pad, 2D]
    fp_ref[...] = fp

    # classification head (outputs lane-padded to 128)
    y = jnp.dot(fp.astype(jnp.bfloat16), wo_ref[...],
                preferred_element_type=jnp.float32) + bo_ref[...]
    logits_ref[...] = y

    # grouped softmax vectorized across the full 128-lane vreg:
    # shared row-max shift (softmax is shift-invariant per group), exp,
    # per-lane group sums via one small one-hot matmul, Newton-corrected
    # approximate reciprocal, single lane-dense store.
    lane = jax.lax.broadcasted_iota(jnp.int32, y.shape, 1)
    valid = lane < n_valid_out
    rowmax = jnp.max(jnp.where(valid, y, -3.4e38), axis=-1, keepdims=True)
    e = jnp.where(valid, jnp.exp(y - rowmax), 0.0).astype(jnp.bfloat16)
    s = jnp.dot(e, gsum_ref[...], preferred_element_type=jnp.float32)
    s = jnp.where(valid, jnp.maximum(s, 1e-30), 1.0)
    r = pl.reciprocal(s, approx=True)
    r = r * (2.0 - s * r)                                # one Newton step
    probs_ref[...] = e.astype(jnp.float32) * r


def tail_fused(g, wd, bd, onehot, memb_col, wo, bo, gsum, *, n_valid_out):
    k, n_pad, c = g.shape
    b_pad = onehot.shape[0]
    d_out = wd.shape[1]
    out_pad = wo.shape[1]
    return pl.pallas_call(
        functools.partial(_tail_kernel, n_valid_out=n_valid_out),
        out_shape=(jax.ShapeDtypeStruct((b_pad, out_pad), jnp.float32),
                   jax.ShapeDtypeStruct((b_pad, out_pad), jnp.float32),
                   jax.ShapeDtypeStruct((b_pad, 2 * d_out), jnp.float32)),
        grid=(1,),
        in_specs=[
            pl.BlockSpec((k, n_pad, c), lambda i: (0, 0, 0)),
            pl.BlockSpec((c, d_out), lambda i: (0, 0)),
            pl.BlockSpec((1, d_out), lambda i: (0, 0)),
            pl.BlockSpec((b_pad, n_pad), lambda i: (0, 0)),
            pl.BlockSpec((n_pad, 1), lambda i: (0, 0)),
            pl.BlockSpec((2 * d_out, out_pad), lambda i: (0, 0)),
            pl.BlockSpec((1, out_pad), lambda i: (0, 0)),
            pl.BlockSpec((out_pad, out_pad), lambda i: (0, 0)),
        ],
        out_specs=(pl.BlockSpec((b_pad, out_pad), lambda i: (0, 0)),
                   pl.BlockSpec((b_pad, out_pad), lambda i: (0, 0)),
                   pl.BlockSpec((b_pad, 2 * d_out), lambda i: (0, 0))),
        compiler_params=pltpu.CompilerParams(dimension_semantics=("arbitrary",)),
    )(g, wd, bd, onehot, memb_col, wo, bo, gsum)


# --------------------------- glue: graph arrays ----------------------------

def build_graph_arrays(deg_slice_np, deg_adjs, membership, n_atoms, batch_size):
    n_pad = _ceil_to(n_atoms, 16)     # 16: bf16 sublane tile
    b_pad = _ceil_to(batch_size, 8)

    deg_of_atom = np.full((n_pad, 1), -1, np.int32)     # padded atoms never match
    for d in range(NUM_DEG):
        s, c = int(deg_slice_np[d, 0]), int(deg_slice_np[d, 1])
        deg_of_atom[s:s + c, 0] = d

    # TODO(synk): adjacency / neighbor-index construction from the ragged
    # ConvMol lists is data-dependent scatter and stays in XLA glue (built once
    # per batch).
    adj = jnp.zeros((n_pad, n_pad), jnp.float32)
    nbr_idx = jnp.tile(jnp.arange(n_pad, dtype=jnp.int32)[None, :], (MAX_DEG + 1, 1))
    for d in range(1, MAX_DEG + 1):
        s, c = int(deg_slice_np[d, 0]), int(deg_slice_np[d, 1])
        if c == 0:
            continue
        rows = jnp.arange(s, s + c, dtype=jnp.int32)
        a = deg_adjs[d - 1].astype(jnp.int32)                       # [c, d]
        adj = adj.at[rows[:, None], a].add(1.0)
        slots = 1 + jnp.arange(d, dtype=jnp.int32)
        nbr_idx = nbr_idx.at[slots[:, None], rows[None, :]].set(a.T)  # row 0 stays "self"

    memb_col = np.full((n_pad, 1), -1, np.int32)
    memb_col[:n_atoms, 0] = np.asarray(membership).astype(np.int32)
    onehot = (memb_col[:, 0][None, :] == np.arange(b_pad)[:, None]).astype(np.float32)
    return dict(n_pad=n_pad, b_pad=b_pad,
                adj=adj.astype(jnp.bfloat16),
                nbr_idx=nbr_idx,                              # [MAX_DEG+1, n_pad]
                deg_col=jnp.asarray(deg_of_atom),
                memb_col=jnp.asarray(memb_col),
                onehot=jnp.asarray(onehot, dtype=jnp.bfloat16))


# ---------------------- params (torch layout) + prep -----------------------

def init_params(key, number_input_features, graph_conv_layers, dense_layer_size,
                n_tasks, n_classes):
    num_w = 2 * MAX_DEG + (1 - MIN_DEG)   # 21 weight/bias pairs per GraphConv layer
    keys = jax.random.split(key, 2 * num_w + 4)
    ki = 0
    params = {"graph_convs": []}
    for layer_size, in_feat in zip(graph_conv_layers, number_input_features):
        Ws, bs = [], []
        for _ in range(num_w):
            Ws.append(0.1 * jax.random.normal(keys[ki], (in_feat, layer_size), jnp.float32))
            bs.append(jnp.zeros((layer_size,), jnp.float32))
            ki += 1
        params["graph_convs"].append((Ws, bs))
    params["dense_w"] = 0.1 * jax.random.normal(
        keys[ki], (graph_conv_layers[-1], dense_layer_size), jnp.float32); ki += 1
    params["dense_b"] = jnp.zeros((dense_layer_size,), jnp.float32)
    params["out_w"] = 0.1 * jax.random.normal(
        keys[ki], (2 * dense_layer_size, n_tasks * n_classes), jnp.float32); ki += 1
    params["out_b"] = jnp.zeros((n_tasks * n_classes,), jnp.float32)
    return params


def prepare_params(params, number_input_features, n_tasks, n_classes):
    """Hoisted (done once): stack per-degree [rel; self] weights along K and
    degrees along N (lane-padded), cast MXU operands to bf16, lane-pad the
    dense / head weights, build the softmax group-sum matrix."""
    prepped = {"layers": []}
    for li, (Ws, bs) in enumerate(params["graph_convs"]):
        in_feat, out_c = Ws[0].shape
        f_vis = _ceil_to(number_input_features[0], LANE) if li == 0 else C_PAD
        w_big = np.zeros((2 * f_vis, NUM_DEG * C_PAD), np.float32)
        b_big = np.zeros((1, NUM_DEG * C_PAD), np.float32)
        # degree 0: self-only term (rel block stays zero)
        w_big[f_vis:f_vis + in_feat, 0:out_c] = np.asarray(Ws[2 * MAX_DEG])
        b_big[0, 0:out_c] = np.asarray(bs[2 * MAX_DEG])
        for d in range(1, MAX_DEG + 1):
            col = d * C_PAD
            w_big[0:in_feat, col:col + out_c] = np.asarray(Ws[2 * (d - 1)])            # rel
            w_big[f_vis:f_vis + in_feat, col:col + out_c] = np.asarray(Ws[2 * (d - 1) + 1])  # self
            b_big[0, col:col + out_c] = np.asarray(bs[2 * (d - 1)] + bs[2 * (d - 1) + 1])
        prepped["layers"].append(dict(w=jnp.asarray(w_big, jnp.bfloat16),
                                      b=jnp.asarray(b_big, jnp.float32)))

    dense_w = np.asarray(params["dense_w"])                 # [64, D]
    d_out = dense_w.shape[1]
    wd = np.zeros((C_PAD, d_out), np.float32)
    wd[:dense_w.shape[0], :] = dense_w
    prepped["dense_w"] = jnp.asarray(wd, jnp.bfloat16)
    prepped["dense_b"] = jnp.asarray(np.asarray(params["dense_b"]).reshape(1, -1), jnp.float32)

    tc = n_tasks * n_classes
    out_pad = _ceil_to(tc, LANE)
    wo = np.zeros((2 * d_out, out_pad), np.float32)
    wo[:, :tc] = np.asarray(params["out_w"])
    bo = np.zeros((1, out_pad), np.float32)
    bo[0, :tc] = np.asarray(params["out_b"])
    prepped["out_w"] = jnp.asarray(wo, jnp.bfloat16)
    prepped["out_b"] = jnp.asarray(bo, jnp.float32)

    lane = np.arange(out_pad)
    same = ((lane[:, None] // n_classes == lane[None, :] // n_classes)
            & (lane[:, None] < tc) & (lane[None, :] < tc))
    prepped["gsum"] = jnp.asarray(same.astype(np.float32), jnp.bfloat16)
    return prepped


# ------------------------------ forward pass -------------------------------

def graph_conv_model_forward(prepped, graph, atom_features, n_samples, batch_size,
                             n_tasks, n_classes):
    n_pad = graph["n_pad"]
    n, f0 = atom_features.shape
    f0_pad = _ceil_to(f0, LANE)
    x = jnp.pad(atom_features.astype(jnp.float32), ((0, n_pad - n), (0, f0_pad - f0)))

    layers = prepped["layers"]
    gc = fused_graph_conv(x, graph["adj"], graph["deg_col"],
                          layers[0]["w"], layers[0]["b"], pool_input=False)
    for layer in layers[1:]:
        # TODO(synk): data-dependent ragged neighbor gather stays in XLA glue.
        g = jnp.take(gc, graph["nbr_idx"], axis=0)   # [MAX_DEG+1, n_pad, C_PAD] bf16
        gc = fused_graph_conv(g, graph["adj"], graph["deg_col"],
                              layer["w"], layer["b"], pool_input=True)

    g = jnp.take(gc, graph["nbr_idx"], axis=0)       # for the final GraphPool
    probs_pad, logits_pad, fp_pad = tail_fused(
        g, prepped["dense_w"], prepped["dense_b"], graph["onehot"], graph["memb_col"],
        prepped["out_w"], prepped["out_b"], prepped["gsum"],
        n_valid_out=n_tasks * n_classes)

    tc = n_tasks * n_classes
    logits = logits_pad[:n_samples, :tc].reshape(-1, n_tasks, n_classes)   # TrimGraphOutput
    probs = probs_pad[:n_samples, :tc].reshape(-1, n_tasks, n_classes)
    neural_fingerprint = fp_pad[:batch_size]
    return [probs, logits, neural_fingerprint]


# -------------------------- pure-JAX reference ------------------------------

def reference_forward(params, atom_features, deg_slice_np, membership, n_samples,
                      deg_adjs, batch_size, n_tasks, n_classes):
    x = atom_features.astype(jnp.float32)
    for (Ws, bs) in params["graph_convs"]:
        outs = [None] * NUM_DEG
        for d in range(1, MAX_DEG + 1):
            s, c = int(deg_slice_np[d, 0]), int(deg_slice_np[d, 1])
            if c == 0:
                continue
            rel = jnp.sum(x[deg_adjs[d - 1]], axis=1)
            self_a = x[s:s + c]
            outs[d] = (rel @ Ws[2 * (d - 1)] + bs[2 * (d - 1)]
                       + self_a @ Ws[2 * (d - 1) + 1] + bs[2 * (d - 1) + 1])
        s, c = int(deg_slice_np[0, 0]), int(deg_slice_np[0, 1])
        if c > 0:
            outs[0] = x[s:s + c] @ Ws[2 * MAX_DEG] + bs[2 * MAX_DEG]
        gc = jax.nn.relu(jnp.concatenate([o for o in outs if o is not None], axis=0))
        pooled = [None] * NUM_DEG
        for d in range(1, MAX_DEG + 1):
            s, c = int(deg_slice_np[d, 0]), int(deg_slice_np[d, 1])
            if c == 0:
                continue
            stacked = jnp.concatenate([gc[s:s + c][:, None, :], gc[deg_adjs[d - 1]]], axis=1)
            pooled[d] = jnp.max(stacked, axis=1)
        s, c = int(deg_slice_np[0, 0]), int(deg_slice_np[0, 1])
        if c > 0:
            pooled[0] = gc[s:s + c]
        x = jnp.concatenate([p for p in pooled if p is not None], axis=0)
    dense = jax.nn.relu(x @ params["dense_w"] + params["dense_b"])
    onehot = (membership[None, :] == jnp.arange(batch_size)[:, None]).astype(jnp.float32)
    sums = onehot @ dense
    maxs = jnp.stack([jnp.max(jnp.where((membership == b)[:, None], dense, -jnp.inf), axis=0)
                      for b in range(batch_size)])
    fp = jnp.tanh(jnp.concatenate([sums, maxs], axis=1))
    logits = (fp @ params["out_w"] + params["out_b"]).reshape(-1, n_tasks, n_classes)
    logits = logits[:n_samples]
    probs = jax.nn.softmax(logits, axis=-1)
    return probs, logits, fp


if __name__ == "__main__":
    # Model config matching the module: graph_conv_layers=[64,64], dense=128,
    # number_atom_features=75, classification, batch_normalize=False.
    n_atom_feat = 75
    graph_conv_layers = [64, 64]
    number_input_features = [75, 64]
    dense_layer_size = 128
    n_tasks, n_classes = 3, 2

    # Synthetic agglomerated ConvMol batch: 3 molecules, 8 atoms total,
    # atoms sorted by degree (deg 0: 1 atom, deg 1: 2 atoms, deg 2: 5 atoms).
    deg_slice_np = np.array([[0, 1], [1, 2], [3, 5]] + [[8, 0]] * 8, dtype=np.int64)
    membership = jnp.array([1, 0, 0, 0, 2, 2, 2, 2], dtype=jnp.int32)
    n_samples = 3
    batch_size = 3      # every GraphGather segment nonempty (empty-segment max undefined)
    deg_adjs = [
        jnp.array([[3], [3]], dtype=jnp.int32),                                  # degree-1 atoms
        jnp.array([[1, 2], [5, 7], [4, 6], [5, 7], [6, 4]], dtype=jnp.int32),    # degree-2 atoms
    ]
    for d in range(3, MAX_DEG + 1):
        deg_adjs.append(jnp.zeros((0, d), dtype=jnp.int32))

    key = jax.random.PRNGKey(0)
    k_feat, k_param = jax.random.split(key)
    atom_features = jax.random.normal(k_feat, (8, n_atom_feat), jnp.float32)
    params = init_params(k_param, number_input_features, graph_conv_layers,
                         dense_layer_size, n_tasks, n_classes)
    prepped = prepare_params(params, number_input_features, n_tasks, n_classes)
    graph = build_graph_arrays(deg_slice_np, deg_adjs, membership,
                               atom_features.shape[0], batch_size)

    outputs = graph_conv_model_forward(prepped, graph, atom_features, n_samples,
                                       batch_size, n_tasks, n_classes)
    for o in outputs:
        jax.block_until_ready(o)

    probs, logits, fingerprint = outputs
    assert probs.shape == (n_samples, n_tasks, n_classes)
    assert logits.shape == (n_samples, n_tasks, n_classes)
    assert fingerprint.shape == (batch_size, 2 * dense_layer_size)
    assert bool(jnp.allclose(jnp.sum(probs, axis=-1), 1.0, atol=1e-4))

    ref_probs, ref_logits, ref_fp = reference_forward(
        params, atom_features, deg_slice_np, membership, n_samples, deg_adjs,
        batch_size, n_tasks, n_classes)
    # loose tolerance: Pallas path uses bf16 MXU operands / bf16 intermediates
    # (f32 accumulate)
    assert bool(jnp.allclose(probs, ref_probs, atol=0.1))
    assert bool(jnp.allclose(logits, ref_logits, atol=0.1))
    assert bool(jnp.allclose(fingerprint, ref_fp, atol=0.1))
    print("KERNEL_OK")
</pallas_src>

<mosaic_0001>
module attributes {stable_mosaic.version = 11 : i64} {
  func.func @_fused_conv_kernel(%arg0: i32, %arg1: memref<16x128xf32, #tpu.memory_space<vmem>>, %arg2: memref<16x16xbf16, #tpu.memory_space<vmem>>, %arg3: memref<16x1xi32, #tpu.memory_space<vmem>>, %arg4: memref<256x1408xbf16, #tpu.memory_space<vmem>>, %arg5: memref<1x1408xf32, #tpu.memory_space<vmem>>, %arg6: memref<16x128xbf16, #tpu.memory_space<vmem>>) attributes {dimension_semantics = [#tpu.dimension_semantics<arbitrary>], iteration_bounds = array<i64: 1>, scalar_prefetch = 0 : i64, scratch_operands = 0 : i64, tpu.core_type = #tpu.core_type<tc>, window_params = [{pipeline_mode = #tpu.pipeline_mode<synchronous>, transform_indices = @transform_0, window_bounds = array<i64: 16, 128>}, {pipeline_mode = #tpu.pipeline_mode<synchronous>, transform_indices = @transform_1, window_bounds = array<i64: 16, 16>}, {pipeline_mode = #tpu.pipeline_mode<synchronous>, transform_indices = @transform_2, window_bounds = array<i64: 16, 1>}, {pipeline_mode = #tpu.pipeline_mode<synchronous>, transform_indices = @transform_3, window_bounds = array<i64: 256, 1408>}, {pipeline_mode = #tpu.pipeline_mode<synchronous>, transform_indices = @transform_4, window_bounds = array<i64: 1, 1408>}, {pipeline_mode = #tpu.pipeline_mode<synchronous>, transform_indices = @transform_5, window_bounds = array<i64: 16, 128>}]} {
    %c0 = arith.constant 0 : index
    %c0_0 = arith.constant 0 : index
    %0 = vector.load %arg1[%c0, %c0_0] : memref<16x128xf32, #tpu.memory_space<vmem>>, vector<16x128xf32>
    %1 = arith.truncf %0 : vector<16x128xf32> to vector<16x128xbf16>
    %c0_1 = arith.constant 0 : index
    %c0_2 = arith.constant 0 : index
    %2 = vector.load %arg2[%c0_1, %c0_2] : memref<16x16xbf16, #tpu.memory_space<vmem>>, vector<16x16xbf16>
    %cst = arith.constant dense<0.000000e+00> : vector<16x128xf32>
    %3 = tpu.matmul %2, %1, %cst {dimension_numbers = #tpu.dot_dimension_numbers<[1], [0], [0], [1], [0, 0, 1, 1], [], []>} : vector<16x16xbf16>, vector<16x128xbf16>, vector<16x128xf32> -> vector<16x128xf32>
    %4 = arith.truncf %3 : vector<16x128xf32> to vector<16x128xbf16>
    %5 = tpu.concatenate %4, %1 in 1 : vector<16x128xbf16>, vector<16x128xbf16> -> vector<16x256xbf16>
    %c0_3 = arith.constant 0 : index
    %c0_4 = arith.constant 0 : index
    %6 = vector.load %arg4[%c0_3, %c0_4] : memref<256x1408xbf16, #tpu.memory_space<vmem>>, vector<256x1408xbf16>
    %cst_5 = arith.constant dense<0.000000e+00> : vector<16x1408xf32>
    %7 = tpu.matmul %5, %6, %cst_5 {dimension_numbers = #tpu.dot_dimension_numbers<[1], [0], [0], [1], [0, 0, 1, 1], [], []>} : vector<16x256xbf16>, vector<256x1408xbf16>, vector<16x1408xf32> -> vector<16x1408xf32>
    %c0_6 = arith.constant 0 : index
    %c0_7 = arith.constant 0 : index
    %8 = vector.load %arg5[%c0_6, %c0_7] : memref<1x1408xf32, #tpu.memory_space<vmem>>, vector<1x1408xf32>
    %9 = vector.broadcast %8 : vector<1x1408xf32> to vector<16x1408xf32>
    %10 = arith.addf %7, %9 : vector<16x1408xf32>
    %c0_8 = arith.constant 0 : index
    %c0_9 = arith.constant 0 : index
    %11 = vector.load %arg3[%c0_8, %c0_9] : memref<16x1xi32, #tpu.memory_space<vmem>>, vector<16x1xi32>
    %cst_10 = arith.constant 0.000000e+00 : f32
    %12 = vector.broadcast %cst_10 : f32 to vector<16x128xf32>
    %c0_i32 = arith.constant 0 : i32
    %13 = vector.broadcast %c0_i32 : i32 to vector<16x1xi32>
    %14 = arith.cmpi eq, %11, %13 : vector<16x1xi32>
    %15 = vector.extract_strided_slice %10 {offsets = [0, 0], sizes = [16, 128], strides = [1, 1]} : vector<16x1408xf32> to vector<16x128xf32>
    %16 = vector.shape_cast %14 : vector<16x1xi1> to vector<16x1xi1>
    %17 = vector.broadcast %16 : vector<16x1xi1> to vector<16x128xi1>
    %18 = arith.select %17, %15, %12 : vector<16x128xi1>, vector<16x128xf32>
    %c1_i32 = arith.constant 1 : i32
    %19 = vector.broadcast %c1_i32 : i32 to vector<16x1xi32>
    %20 = arith.cmpi eq, %11, %19 : vector<16x1xi32>
    %21 = vector.extract_strided_slice %10 {offsets = [0, 128], sizes = [16, 128], strides = [1, 1]} : vector<16x1408xf32> to vector<16x128xf32>
    %22 = vector.shape_cast %20 : vector<16x1xi1> to vector<16x1xi1>
    %23 = vector.broadcast %22 : vector<16x1xi1> to vector<16x128xi1>
    %24 = arith.select %23, %21, %18 : vector<16x128xi1>, vector<16x128xf32>
    %c2_i32 = arith.constant 2 : i32
    %25 = vector.broadcast %c2_i32 : i32 to vector<16x1xi32>
    %26 = arith.cmpi eq, %11, %25 : vector<16x1xi32>
    %27 = vector.extract_strided_slice %10 {offsets = [0, 256], sizes = [16, 128], strides = [1, 1]} : vector<16x1408xf32> to vector<16x128xf32>
    %28 = vector.shape_cast %26 : vector<16x1xi1> to vector<16x1xi1>
    %29 = vector.broadcast %28 : vector<16x1xi1> to vector<16x128xi1>
    %30 = arith.select %29, %27, %24 : vector<16x128xi1>, vector<16x128xf32>
    %c3_i32 = arith.constant 3 : i32
    %31 = vector.broadcast %c3_i32 : i32 to vector<16x1xi32>
    %32 = arith.cmpi eq, %11, %31 : vector<16x1xi32>
    %33 = vector.extract_strided_slice %10 {offsets = [0, 384], sizes = [16, 128], strides = [1, 1]} : vector<16x1408xf32> to vector<16x128xf32>
    %34 = vector.shape_cast %32 : vector<16x1xi1> to vector<16x1xi1>
    %35 = vector.broadcast %34 : vector<16x1xi1> to vector<16x128xi1>
    %36 = arith.select %35, %33, %30 : vector<16x128xi1>, vector<16x128xf32>
    %c4_i32 = arith.constant 4 : i32
    %37 = vector.broadcast %c4_i32 : i32 to vector<16x1xi32>
    %38 = arith.cmpi eq, %11, %37 : vector<16x1xi32>
    %39 = vector.extract_strided_slice %10 {offsets = [0, 512], sizes = [16, 128], strides = [1, 1]} : vector<16x1408xf32> to vector<16x128xf32>
    %40 = vector.shape_cast %38 : vector<16x1xi1> to vector<16x1xi1>
    %41 = vector.broadcast %40 : vector<16x1xi1> to vector<16x128xi1>
    %42 = arith.select %41, %39, %36 : vector<16x128xi1>, vector<16x128xf32>
    %c5_i32 = arith.constant 5 : i32
    %43 = vector.broadcast %c5_i32 : i32 to vector<16x1xi32>
    %44 = arith.cmpi eq, %11, %43 : vector<16x1xi32>
    %45 = vector.extract_strided_slice %10 {offsets = [0, 640], sizes = [16, 128], strides = [1, 1]} : vector<16x1408xf32> to vector<16x128xf32>
    %46 = vector.shape_cast %44 : vector<16x1xi1> to vector<16x1xi1>
    %47 = vector.broadcast %46 : vector<16x1xi1> to vector<16x128xi1>
    %48 = arith.select %47, %45, %42 : vector<16x128xi1>, vector<16x128xf32>
    %c6_i32 = arith.constant 6 : i32
    %49 = vector.broadcast %c6_i32 : i32 to vector<16x1xi32>
    %50 = arith.cmpi eq, %11, %49 : vector<16x1xi32>
    %51 = vector.extract_strided_slice %10 {offsets = [0, 768], sizes = [16, 128], strides = [1, 1]} : vector<16x1408xf32> to vector<16x128xf32>
    %52 = vector.shape_cast %50 : vector<16x1xi1> to vector<16x1xi1>
    %53 = vector.broadcast %52 : vector<16x1xi1> to vector<16x128xi1>
    %54 = arith.select %53, %51, %48 : vector<16x128xi1>, vector<16x128xf32>
    %c7_i32 = arith.constant 7 : i32
    %55 = vector.broadcast %c7_i32 : i32 to vector<16x1xi32>
    %56 = arith.cmpi eq, %11, %55 : vector<16x1xi32>
    %57 = vector.extract_strided_slice %10 {offsets = [0, 896], sizes = [16, 128], strides = [1, 1]} : vector<16x1408xf32> to vector<16x128xf32>
    %58 = vector.shape_cast %56 : vector<16x1xi1> to vector<16x1xi1>
    %59 = vector.broadcast %58 : vector<16x1xi1> to vector<16x128xi1>
    %60 = arith.select %59, %57, %54 : vector<16x128xi1>, vector<16x128xf32>
    %c8_i32 = arith.constant 8 : i32
    %61 = vector.broadcast %c8_i32 : i32 to vector<16x1xi32>
    %62 = arith.cmpi eq, %11, %61 : vector<16x1xi32>
    %63 = vector.extract_strided_slice %10 {offsets = [0, 1024], sizes = [16, 128], strides = [1, 1]} : vector<16x1408xf32> to vector<16x128xf32>
    %64 = vector.shape_cast %62 : vector<16x1xi1> to vector<16x1xi1>
    %65 = vector.broadcast %64 : vector<16x1xi1> to vector<16x128xi1>
    %66 = arith.select %65, %63, %60 : vector<16x128xi1>, vector<16x128xf32>
    %c9_i32 = arith.constant 9 : i32
    %67 = vector.broadcast %c9_i32 : i32 to vector<16x1xi32>
    %68 = arith.cmpi eq, %11, %67 : vector<16x1xi32>
    %69 = vector.extract_strided_slice %10 {offsets = [0, 1152], sizes = [16, 128], strides = [1, 1]} : vector<16x1408xf32> to vector<16x128xf32>
    %70 = vector.shape_cast %68 : vector<16x1xi1> to vector<16x1xi1>
    %71 = vector.broadcast %70 : vector<16x1xi1> to vector<16x128xi1>
    %72 = arith.select %71, %69, %66 : vector<16x128xi1>, vector<16x128xf32>
    %c10_i32 = arith.constant 10 : i32
    %73 = vector.broadcast %c10_i32 : i32 to vector<16x1xi32>
    %74 = arith.cmpi eq, %11, %73 : vector<16x1xi32>
    %75 = vector.extract_strided_slice %10 {offsets = [0, 1280], sizes = [16, 128], strides = [1, 1]} : vector<16x1408xf32> to vector<16x128xf32>
    %76 = vector.shape_cast %74 : vector<16x1xi1> to vector<16x1xi1>
    %77 = vector.broadcast %76 : vector<16x1xi1> to vector<16x128xi1>
    %78 = arith.select %77, %75, %72 : vector<16x128xi1>, vector<16x128xf32>
    %cst_11 = arith.constant 0.000000e+00 : f32
    %79 = vector.broadcast %cst_11 : f32 to vector<16x128xf32>
    %80 = arith.maximumf %78, %79 : vector<16x128xf32>
    %81 = arith.truncf %80 : vector<16x128xf32> to vector<16x128xbf16>
    %c0_12 = arith.constant 0 : index
    %c0_13 = arith.constant 0 : index
    %82 = vector.load %arg6[%c0_12, %c0_13] : memref<16x128xbf16, #tpu.memory_space<vmem>>, vector<16x128xbf16>
    tpu.vector_store %arg6[%c0_12, %c0_13], %81 {strides = array<i32>} : memref<16x128xbf16, #tpu.memory_space<vmem>>, vector<16x128xbf16>,
    return
  }
  func.func @transform_0(%arg0: i32) -> (i32, i32) {
    %c0_i32 = arith.constant 0 : i32
    %c0_i32_0 = arith.constant 0 : i32
    %c0_i32_1 = arith.constant 0 : i32
    return %c0_i32, %c0_i32_0 : i32, i32
  }
  func.func @transform_1(%arg0: i32) -> (i32, i32) {
    %c0_i32 = arith.constant 0 : i32
    %c0_i32_0 = arith.constant 0 : i32
    %c0_i32_1 = arith.constant 0 : i32
    return %c0_i32, %c0_i32_0 : i32, i32
  }
  func.func @transform_2(%arg0: i32) -> (i32, i32) {
    %c0_i32 = arith.constant 0 : i32
    %c0_i32_0 = arith.constant 0 : i32
    %c0_i32_1 = arith.constant 0 : i32
    return %c0_i32, %c0_i32_0 : i32, i32
  }
  func.func @transform_3(%arg0: i32) -> (i32, i32) {
    %c0_i32 = arith.constant 0 : i32
    %c0_i32_0 = arith.constant 0 : i32
    %c0_i32_1 = arith.constant 0 : i32
    return %c0_i32, %c0_i32_0 : i32, i32
  }
  func.func @transform_4(%arg0: i32) -> (i32, i32) {
    %c0_i32 = arith.constant 0 : i32
    %c0_i32_0 = arith.constant 0 : i32
    %c0_i32_1 = arith.constant 0 : i32
    return %c0_i32, %c0_i32_0 : i32, i32
  }
  func.func @transform_5(%arg0: i32) -> (i32, i32) {
    %c0_i32 = arith.constant 0 : i32
    %c0_i32_0 = arith.constant 0 : i32
    %c0_i32_1 = arith.constant 0 : i32
    return %c0_i32, %c0_i32_0 : i32, i32
  }
}

</mosaic_0001>

<bundles_post_ra>
// kernel: tpu_custom_call.1
= control target key start
LH: loop header
LB: loop body
LE: loop exit
PB: predicated region body
PF: predicated region fallthrough
CT: control target
= control target key end

     0   :  { %10 = vsyncpa [#allocation3], 0  ;;  %s2454_s0 = inlined_call_operand.vmem [shape: f32[16,128], index: 0, kind: input, shape index: {}]   ;;  %s2455_s1 = inlined_call_operand.hbm [shape: bf16[16,16], index: 1, kind: input, shape index: {}]   ;;  %s2456_s2 = inlined_call_operand.vmem [shape: s32[16,1], index: 2, kind: input, shape index: {}]   ;;  %s2457_s3 = inlined_call_operand.hbm [shape: bf16[256,1408], index: 3, kind: input, shape index: {}]   ;;  %s2458_s4 = inlined_call_operand.vmem [shape: f32[1,1408], index: 4, kind: input, shape index: {}]   ;;  %s2459_s5 = inlined_call_operand.hbm [shape: bf16[16,128], index: 5, kind: output, shape index: {}]  }
   0x1   :  { %11 = vsyncpa [#allocation6], 0 }
   0x2   :  { %12 = vsyncpa [#allocation4], 0  ;;  %s2253_s18 = smov [#allocation2]   ;;  %s2181_s22 = scalar_lea.hbm %s2455_s1, 128 }
   0x3   :  { %s20_s19 = sshll.u32 %s2253_s18, 4  ;;  %p2182_p0 = scmp.ne.s32.totalorder %s2455_s1, %s2181_s22  ;;  %s21_s19 = int_to_ptr.vmem [resolvable:$true] %s20_s19 }
   0x4   :  { %p2185_p1 = scmp.lt.u32.totalorder %s2181_s22, %s2455_s1 }
   0x6   :  { %p2187_p2 = pnand %p2185_p1, %p2182_p0 }
   0x8   :  { %2190 = shalt.err (!%p2187_p2)
}
   0x9   :  { %s2191_s27 = scalar_lea.vmem %s21_s19, 128  ;;  %p2196_p4 = scmp.lt.s32.totalorder %s21_s19, %s21_s19 }
   0xa   :  { %p2192_p3 = scmp.ne.s32.totalorder %s21_s19, %s2191_s27  ;;  %p2197_p5 = scmp.lt.s32.totalorder %s2191_s27, %s2191_s27 }
   0xc   :  { %p2198_p6 = por %p2197_p5, %p2196_p4 }
   0xe   :  { %p2199_p7 = pnand %p2198_p6, %p2192_p3 }
  0x10   :  { %2202 = shalt.err (!%p2199_p7)
}
  0x11   :  { %s2254_s28 = smov 64   ;;  %s2255_s29 = smov 4  }
  0x12   :  { %26 = dma.hbm_to_vmem [thread:$0]  %s2455_s1, 128, %s21_s19, [#allocation3], %s2254_s28, %s2254_s28, %s2255_s29  }
  0x13   :  { %s2256_s7 = smov [#allocation5]   ;;  %s2203_s11 = scalar_lea.hbm %s2457_s3, 22528 }
  0x14   :  { %s34_s8 = sshll.u32 %s2256_s7, 4  ;;  %p2204_p8 = scmp.ne.s32.totalorder %s2457_s3, %s2203_s11  ;;  %s35_s8 = int_to_ptr.vmem [resolvable:$true] %s34_s8 }
  0x15   :  { %p2207_p9 = scmp.lt.u32.totalorder %s2203_s11, %s2457_s3 }
  0x17   :  { %p2209_p10 = pnand %p2207_p9, %p2204_p8 }
  0x19   :  { %2212 = shalt.err (!%p2209_p10)
}
  0x1a   :  { %s2213_s16 = scalar_lea.vmem %s35_s8, 22528  ;;  %p2218_p12 = scmp.lt.s32.totalorder %s35_s8, %s35_s8 }
  0x1b   :  { %p2214_p11 = scmp.ne.s32.totalorder %s35_s8, %s2213_s16  ;;  %p2219_p13 = scmp.lt.s32.totalorder %s2213_s16, %s2213_s16 }
  0x1d   :  { %p2220_p0 = por %p2219_p13, %p2218_p12 }
  0x1f   :  { %p2221_p1 = pnand %p2220_p0, %p2214_p11 }
  0x21   :  { %2224 = shalt.err (!%p2221_p1)
}
  0x22   :  { %s2257_s1 = smov 704   ;;  %s2258_s17 = smov 44  }
  0x23   :  { %40 = dma.hbm_to_vmem [thread:$0]  %s2457_s3, 22528, %s35_s8, [#allocation6], %s2257_s1, %s2257_s1, %s2258_s17  }
  0x24   :  { %2247 = dma.done.wait [#allocation3], 128  }
  0x25   :  { %2248 = vsyncadd [#allocation3], 4294967168 }
  0x26   :  { %2249 = dma.done.wait [#allocation6], 22528  }
  0x27   :  { %2250 = vsyncadd [#allocation6], 4294944768  ;;  %v2259_v0 = vmov 0.0   ;;  %vm2260_vm0 = vmmov 0   ;;  %v50_v1 = vld [vmem:[%s2454_s0] sm:$0xff]  ;;  %v51_v2 = vld [vmem:[%s2454_s0 + $0x8] sm:$0xff] }
  0x28   :  { %1906 = vmatprep.subr.bf16.mxu0 %v2259_v0  ;;  %1908 = vmatprep.mubr.msk.bf16.mxu0 %vm2260_vm0, %v2259_v0  ;;  %v2326_v3 = vpack.c.bf16 %v51_v2, %v50_v1  ;;  %v1924_v4 = vld [vmem:[#allocation2] sm:$0xff]   ;;  %v1925_v5 = vld [vmem:[#allocation5 + $0x4] ss:$44 sps:$4 sm:$0xff]   ;;  %vm60_vm1 = vcmask 130048   ;;  %v1927_v6 = vld [vmem:[#allocation5 + $0x8] ss:$44 sps:$4 sm:$0xff]  }
  0x29   :  { %v1929_v7 = vld [vmem:[#allocation5 + $0xc] ss:$44 sps:$4 sm:$0xff]   ;;  %1253 = vmatprep.subr.bf16.mxu1 %v1925_v5  ;;  %v1931_v9 = vld [vmem:[#allocation5 + $0x5c] ss:$44 sps:$4 sm:$0xff]   ;;  %v1935_v11 = vld [vmem:[#allocation5 + $0x64] ss:$44 sps:$4 sm:$0xff]  }
  0x2a   :  { %1907 = vmatpush3.bf16.msra.mxu0 %v2326_v3  ;;  %1285 = vmatprep.mubr.bf16.mxu1 %v2326_v3  ;;  %v1930_v8 = vld [vmem:[#allocation5] ss:$44 sps:$4 sm:$0xff]   ;;  %v1936_v12 = vld [vmem:[#allocation5 + $0x58] ss:$44 sps:$4 sm:$0xff]   ;;  %v1941_v14 = vld [vmem:[#allocation5 + $0xbc] ss:$44 sps:$4 sm:$0xff]  }
  0x2b   :  { %1296 = vmatprep.subr.bf16.mxu0 %v1929_v7  ;;  %1254 = vmatpush1.bf16.msra.mxu1 %v1930_v8  ;;  %v1933_v10 = vld [vmem:[#allocation5 + $0x60] ss:$44 sps:$4 sm:$0xff]   ;;  %v1942_v15 = vld [vmem:[#allocation5 + $0xb0] ss:$44 sps:$4 sm:$0xff]   ;;  %v1939_v16 = vld [vmem:[#allocation5 + $0xb8] ss:$44 sps:$4 sm:$0xff]  }
  0x2c   :  { %1255 = vmatprep.subr.bf16.mxu1 %v1931_v9  ;;  %v1937_v13 = vld [vmem:[#allocation5 + $0xb4] ss:$44 sps:$4 sm:$0xff]   ;;  %v1943_v17 = vld [vmem:[#allocation5 + $0x10c] ss:$44 sps:$4 sm:$0xff]   ;;  %v1945_v19 = vld [vmem:[#allocation5 + $0x110] ss:$44 sps:$4 sm:$0xff]  }
  0x2d   :  { %1909 = vmatmul.mubr.msk.bf16.vlgmr.msra.gmra.mrb[0].mxu0 %vm60_vm1, %v1924_v4  ;;  %v1947_v18 = vld [vmem:[#allocation5 + $0x114] ss:$44 sps:$4 sm:$0xff]   ;;  %v1949_v21 = vld [vmem:[#allocation5 + $0x164] ss:$44 sps:$4 sm:$0xff]   ;;  %v1953_v22 = vld [vmem:[#allocation5 + $0x16c] ss:$44 sps:$4 sm:$0xff]  }
  0x2e   :  { %1297 = vmatpush1.bf16.msra.mxu0 %v1927_v6  ;;  %1328 = vmatprep.mubr.bf16.mxu0 %v2326_v3  ;;  %v1948_v20 = vld [vmem:[#allocation5 + $0x108] ss:$44 sps:$4 sm:$0xff]   ;;  %v1954_v23 = vld [vmem:[#allocation5 + $0x160] ss:$44 sps:$4 sm:$0xff]   ;;  %v1959_v26 = vld [vmem:[#allocation5 + $0x1c4] ss:$44 sps:$4 sm:$0xff]  }
  0x2f   :  { %1298 = vmatprep.subr.bf16.mxu0 %v1935_v11  ;;  %1256 = vmatpush1.bf16.msra.mxu1 %v1936_v12  ;;  %v1951_v24 = vld [vmem:[#allocation5 + $0x168] ss:$44 sps:$4 sm:$0xff]   ;;  %v1957_v27 = vld [vmem:[#allocation5 + $0x1c0] ss:$44 sps:$4 sm:$0xff]   ;;  %v1960_v28 = vld [vmem:[#allocation5 + $0x1b8] ss:$44 sps:$4 sm:$0xff]  }
  0x30   :  { %1257 = vmatprep.subr.bf16.mxu1 %v1937_v13  ;;  %v1955_v25 = vld [vmem:[#allocation5 + $0x1bc] ss:$44 sps:$4 sm:$0xff]   ;;  %v1961_v29 = vld [vmem:[#allocation5 + $0x214] ss:$44 sps:$4 sm:$0xff]   ;;  %v1963_v32 = vld [vmem:[#allocation5 + $0x218] ss:$44 sps:$4 sm:$0xff]  }
  0x31   :  { %v1965_v30 = vld [vmem:[#allocation5 + $0x21c] ss:$44 sps:$4 sm:$0xff]   ;;  %v1967_v33 = vld [vmem:[#allocation5 + $0x26c] ss:$44 sps:$4 sm:$0xff]   ;;  %v1971_v34 = vld [vmem:[#allocation5 + $0x274] ss:$44 sps:$4 sm:$0xff]  }
  0x32   :  { %1299 = vmatpush1.bf16.msra.mxu0 %v1933_v10  ;;  %v1966_v31 = vld [vmem:[#allocation5 + $0x210] ss:$44 sps:$4 sm:$0xff]   ;;  %v1972_v36 = vld [vmem:[#allocation5 + $0x268] ss:$44 sps:$4 sm:$0xff]   ;;  %v1977_v38 = vld [vmem:[#allocation5 + $0x2cc] ss:$44 sps:$4 sm:$0xff]  }
  0x33   :  { %1300 = vmatprep.subr.bf16.mxu0 %v1941_v14  ;;  %1258 = vmatpush1.bf16.msra.mxu1 %v1942_v15  ;;  %v1969_v35 = vld [vmem:[#allocation5 + $0x270] ss:$44 sps:$4 sm:$0xff]   ;;  %v1978_v39 = vld [vmem:[#allocation5 + $0x2c0] ss:$44 sps:$4 sm:$0xff]   ;;  %v1975_v40 = vld [vmem:[#allocation5 + $0x2c8] ss:$44 sps:$4 sm:$0xff]  }
  0x34   :  { %1259 = vmatprep.subr.bf16.mxu1 %v1943_v17  ;;  %v1973_v37 = vld [vmem:[#allocation5 + $0x2c4] ss:$44 sps:$4 sm:$0xff]   ;;  %v1979_v41 = vld [vmem:[#allocation5 + $0x31c] ss:$44 sps:$4 sm:$0xff]   ;;  %v1981_v43 = vld [vmem:[#allocation5 + $0x320] ss:$44 sps:$4 sm:$0xff]  }
  0x35   :  { %v1983_v42 = vld [vmem:[#allocation5 + $0x324] ss:$44 sps:$4 sm:$0xff]   ;;  %v1985_v45 = vld [vmem:[#allocation5 + $0x374] ss:$44 sps:$4 sm:$0xff]   ;;  %v1989_v46 = vld [vmem:[#allocation5 + $0x37c] ss:$44 sps:$4 sm:$0xff]  }
  0x36   :  { %1301 = vmatpush1.bf16.msra.mxu0 %v1939_v16  ;;  %v1984_v44 = vld [vmem:[#allocation5 + $0x318] ss:$44 sps:$4 sm:$0xff]   ;;  %v1990_v48 = vld [vmem:[#allocation5 + $0x370] ss:$44 sps:$4 sm:$0xff]   ;;  %v1995_v50 = vld [vmem:[#allocation5 + $0x3d4] ss:$44 sps:$4 sm:$0xff]  }
  0x37   :  { %1302 = vmatprep.subr.bf16.mxu0 %v1947_v18  ;;  %1260 = vmatpush1.bf16.msra.mxu1 %v1948_v20  ;;  %v1987_v47 = vld [vmem:[#allocation5 + $0x378] ss:$44 sps:$4 sm:$0xff]   ;;  %v1996_v51 = vld [vmem:[#allocation5 + $0x3c8] ss:$44 sps:$4 sm:$0xff]   ;;  %v1993_v52 = vld [vmem:[#allocation5 + $0x3d0] ss:$44 sps:$4 sm:$0xff]  }
  0x38   :  { %1261 = vmatprep.subr.bf16.mxu1 %v1949_v21  ;;  %v1991_v49 = vld [vmem:[#allocation5 + $0x3cc] ss:$44 sps:$4 sm:$0xff]   ;;  %v1997_v53 = vld [vmem:[#allocation5 + $0x424] ss:$44 sps:$4 sm:$0xff]   ;;  %v1999_v56 = vld [vmem:[#allocation5 + $0x428] ss:$44 sps:$4 sm:$0xff]  }
  0x39   :  { %v2001_v54 = vld [vmem:[#allocation5 + $0x42c] ss:$44 sps:$4 sm:$0xff]   ;;  %v2003_v57 = vld [vmem:[#allocation5 + $0x47c] ss:$44 sps:$4 sm:$0xff]   ;;  %v2007_v58 = vld [vmem:[#allocation5 + $0x484] ss:$44 sps:$4 sm:$0xff]  }
  0x3a   :  { %1303 = vmatpush1.bf16.msra.mxu0 %v1945_v19  ;;  %v2002_v55 = vld [vmem:[#allocation5 + $0x420] ss:$44 sps:$4 sm:$0xff]   ;;  %v2008_v59 = vld [vmem:[#allocation5 + $0x478] ss:$44 sps:$4 sm:$0xff]   ;;  %v2013_v62 = vld [vmem:[#allocation5 + $0x4dc] ss:$44 sps:$4 sm:$0xff]  }
  0x3b   :  { %1304 = vmatprep.subr.bf16.mxu0 %v1953_v22  ;;  %1262 = vmatpush1.bf16.msra.mxu1 %v1954_v23  ;;  %v2005_v60 = vld [vmem:[#allocation5 + $0x480] ss:$44 sps:$4 sm:$0xff]   ;;  %v2014_v63 = vld [vmem:[#allocation5 + $0x4d0] ss:$44 sps:$4 sm:$0xff]   ;;  %v2011_v0 = vld [vmem:[#allocation5 + $0x4d8] ss:$44 sps:$4 sm:$0xff]  }
  0x3c   :  { %1263 = vmatprep.subr.bf16.mxu1 %v1955_v25  ;;  %v2009_v61 = vld [vmem:[#allocation5 + $0x4d4] ss:$44 sps:$4 sm:$0xff]   ;;  %v2015_v1 = vld [vmem:[#allocation5 + $0x52c] ss:$44 sps:$4 sm:$0xff]   ;;  %v2017_v4 = vld [vmem:[#allocation5 + $0x530] ss:$44 sps:$4 sm:$0xff]  }
  0x3d   :  { %v2019_v2 = vld [vmem:[#allocation5 + $0x534] ss:$44 sps:$4 sm:$0xff]   ;;  %v2026_v7 = vld [vmem:[#allocation5 + $0x1c] ss:$44 sps:$4 sm:$0xff]   ;;  %v2261_v8 = vmov 0  }
  0x3e   :  { %1305 = vmatpush1.bf16.msra.mxu0 %v1951_v24  ;;  %v2020_v5 = vld [vmem:[#allocation5 + $0x528] ss:$44 sps:$4 sm:$0xff]   ;;  %1922 = vset.pattern.permute.xlu0 %v2261_v8  ;;  %v2335_v9 = vld [vmem:[%s2456_s2] sm:$0xff]  ;;  %v2345_v12 = vld [vmem:[%s2456_s2 + $0x8] sm:$0xff] }
  0x3f   :  { %1306 = vmatprep.subr.bf16.mxu0 %v1959_v26  ;;  %1264 = vmatpush1.bf16.msra.mxu1 %v1960_v28  ;;  %v2023_v6 = vld [vmem:[#allocation5 + $0x14] ss:$44 sps:$4 sm:$0xff]   ;;  %vm1511_vm2 = vcmp.eq.s32.totalorder %v2335_v9, 0  ;;  %vm1525_vm3 = vcmp.eq.s32.totalorder %v2335_v9, 1  ;;  %vm1512_vm4 = vcmp.eq.s32.totalorder %v2345_v12, 0  ;;  %vm1526_vm5 = vcmp.eq.s32.totalorder %v2345_v12, 1 }
  0x40   :  { %1265 = vmatprep.subr.bf16.mxu1 %v1961_v29  ;;  %1923 = vset.pattern.permute.xlu1 %v2261_v8  ;;  %v1513_v10 = vsel %vm1511_vm2, 1, %v2261_v8  ;;  %v1527_v11 = vsel %vm1525_vm3, 1, %v2261_v8  ;;  %v1514_v13 = vsel %vm1512_vm4, 1, %v2261_v8  ;;  %v1528_v14 = vsel %vm1526_vm5, 1, %v2261_v8  ;;  %v2021_v22 = vld [vmem:[#allocation5 + $0x10] ss:$44 sps:$4 sm:$0xff]  }
  0x41   :  { %1516 = vperm.xlu0 %1922, %v1513_v10   ;;  %1530 = vperm.xlu1 %1923, %v1527_v11   ;;  %vm1539_vm6 = vcmp.eq.s32.totalorder %v2335_v9, 2  ;;  %vm1540_vm7 = vcmp.eq.s32.totalorder %v2345_v12, 2  ;;  %vm1553_vm8 = vcmp.eq.s32.totalorder %v2335_v9, 3  ;;  %vm1554_vm9 = vcmp.eq.s32.totalorder %v2345_v12, 3  ;;  %v2024_v23 = vld [vmem:[#allocation5 + $0x18] ss:$44 sps:$4 sm:$0xff]  }
  0x42   :  { %1307 = vmatpush1.bf16.msra.mxu0 %v1957_v27  ;;  %v1541_v15 = vsel %vm1539_vm6, 1, %v2261_v8  ;;  %v1542_v16 = vsel %vm1540_vm7, 1, %v2261_v8  ;;  %v1555_v17 = vsel %vm1553_vm8, 1, %v2261_v8  ;;  %v1556_v18 = vsel %vm1554_vm9, 1, %v2261_v8  ;;  %v2029_v26 = vld [vmem:[#allocation5 + $0x6c] ss:$44 sps:$4 sm:$0xff]  }
  0x43   :  { %1308 = vmatprep.subr.bf16.mxu0 %v1965_v30  ;;  %1266 = vmatpush1.bf16.msra.mxu1 %v1966_v31  ;;  %v2032_v27 = vld [vmem:[#allocation5 + $0x74] ss:$44 sps:$4 sm:$0xff]   ;;  %vm1567_vm10 = vcmp.eq.s32.totalorder %v2335_v9, 4  ;;  %vm1568_vm11 = vcmp.eq.s32.totalorder %v2345_v12, 4  ;;  %vm1581_vm12 = vcmp.eq.s32.totalorder %v2335_v9, 5  ;;  %vm1582_vm13 = vcmp.eq.s32.totalorder %v2345_v12, 5 }
  0x44   :  { %1267 = vmatprep.subr.bf16.mxu1 %v1967_v33  ;;  %v2027_v28 = vld [vmem:[#allocation5 + $0x68] ss:$44 sps:$4 sm:$0xff]   ;;  %v2030_v29 = vld [vmem:[#allocation5 + $0x70] ss:$44 sps:$4 sm:$0xff]   ;;  %v1569_v30 = vsel %vm1567_vm10, 1, %v2261_v8  ;;  %v1570_v31 = vsel %vm1568_vm11, 1, %v2261_v8 }
  0x45   :  { %1519 = vperm.xlu0 %1922, %v1514_v13   ;;  %1533 = vperm.xlu1 %1923, %v1528_v14   ;;  %v2038_v33 = vld [vmem:[#allocation5 + $0xcc] ss:$44 sps:$4 sm:$0xff]   ;;  %vm1609_vm14 = vcmp.eq.s32.totalorder %v2335_v9, 7  ;;  %vm1624_vm15 = vcmp.eq.s32.totalorder %v2345_v12, 8  ;;  %vm1623_vm0 = vcmp.eq.s32.totalorder %v2335_v9, 8  ;;  %vm1638_vm1 = vcmp.eq.s32.totalorder %v2345_v12, 9 }
  0x46   :  { %1309 = vmatpush1.bf16.msra.mxu0 %v1963_v32  ;;  %v2035_v32 = vld [vmem:[#allocation5 + $0xc4] ss:$44 sps:$4 sm:$0xff]   ;;  %vm1637_vm2 = vcmp.eq.s32.totalorder %v2335_v9, 9  ;;  %vm1595_vm3 = vcmp.eq.s32.totalorder %v2335_v9, 6  ;;  %vm1596_vm4 = vcmp.eq.s32.totalorder %v2345_v12, 6  ;;  %vm1652_vm5 = vcmp.eq.s32.totalorder %v2345_v12, 10 }
  0x47   :  { %1310 = vmatprep.subr.bf16.mxu0 %v1971_v34  ;;  %1268 = vmatpush1.bf16.msra.mxu1 %v1972_v36  ;;  %v2033_v34 = vld [vmem:[#allocation5 + $0xc0] ss:$44 sps:$4 sm:$0xff]   ;;  %v1584_v36 = vsel %vm1582_vm13, 1, %v2261_v8  ;;  %vm1651_vm6 = vcmp.eq.s32.totalorder %v2335_v9, 10  ;;  %vm1610_vm7 = vcmp.eq.s32.totalorder %v2345_v12, 7 }
  0x48   :  { %1269 = vmatprep.subr.bf16.mxu1 %v1973_v37  ;;  %v1611_v37 = vsel %vm1609_vm14, 1, %v2261_v8  ;;  %v2077_v9 = vld [vmem:[#allocation5 + $0x32c] ss:$44 sps:$4 sm:$0xff]   ;;  %v2080_v10 = vld [vmem:[#allocation5 + $0x334] ss:$44 sps:$4 sm:$0xff]  }
  0x49   :  { %1544 = vperm.xlu0 %1922, %v1541_v15   ;;  %1547 = vperm.xlu1 %1923, %v1542_v16   ;;  %v2075_v11 = vld [vmem:[#allocation5 + $0x328] ss:$44 sps:$4 sm:$0xff]   ;;  %v2078_v12 = vld [vmem:[#allocation5 + $0x330] ss:$44 sps:$4 sm:$0xff]   ;;  %v2086_v14 = vld [vmem:[#allocation5 + $0x38c] ss:$44 sps:$4 sm:$0xff]  }
  0x4a   :  { %1311 = vmatpush1.bf16.msra.mxu0 %v1969_v35  ;;  %v1583_v35 = vsel %vm1581_vm12, 1, %v2261_v8  ;;  %v2083_v13 = vld [vmem:[#allocation5 + $0x384] ss:$44 sps:$4 sm:$0xff]   ;;  %v2081_v15 = vld [vmem:[#allocation5 + $0x380] ss:$44 sps:$4 sm:$0xff]  }
  0x4b   :  { %1312 = vmatprep.subr.bf16.mxu0 %v1977_v38  ;;  %1270 = vmatpush1.bf16.msra.mxu1 %v1978_v39  ;;  %v2036_v38 = vld [vmem:[#allocation5 + $0xc8] ss:$44 sps:$4 sm:$0xff]  }
  0x4c   :  { %1271 = vmatprep.subr.bf16.mxu1 %v1979_v41  ;;  %v2041_v39 = vld [vmem:[#allocation5 + $0x11c] ss:$44 sps:$4 sm:$0xff]   ;;  %v1625_v41 = vsel %vm1623_vm0, 1, %v2261_v8 }
  0x4d   :  { %1558 = vperm.xlu0 %1922, %v1555_v17   ;;  %1561 = vperm.xlu1 %1923, %v1556_v18   ;;  %v2084_v16 = vld [vmem:[#allocation5 + $0x388] ss:$44 sps:$4 sm:$0xff]   ;;  %v2092_v18 = vld [vmem:[#allocation5 + $0x3e4] ss:$44 sps:$4 sm:$0xff]  }
  0x4e   :  { %1313 = vmatpush1.bf16.msra.mxu0 %v1975_v40  ;;  %v1626_v40 = vsel %vm1624_vm15, 1, %v2261_v8  ;;  %v2089_v17 = vld [vmem:[#allocation5 + $0x3dc] ss:$44 sps:$4 sm:$0xff]  }
  0x4f   :  { %1314 = vmatprep.subr.bf16.mxu0 %v1983_v42  ;;  %1272 = vmatpush1.bf16.msra.mxu1 %v1984_v44  ;;  %v1640_v42 = vsel %vm1638_vm1, 1, %v2261_v8  ;;  %v2044_v44 = vld [vmem:[#allocation5 + $0x124] ss:$44 sps:$4 sm:$0xff]  }
  0x50   :  { %1273 = vmatprep.subr.bf16.mxu1 %v1985_v45  ;;  %v1654_v45 = vsel %vm1652_vm5, 1, %v2261_v8 }
  0x51   :  { %1572 = vperm.xlu0 %1922, %v1569_v30   ;;  %1575 = vperm.xlu1 %1923, %v1570_v31   ;;  %v2107_v30 = vld [vmem:[#allocation5 + $0x4e4] ss:$44 sps:$4 sm:$0xff]   ;;  %v2110_v31 = vld [vmem:[#allocation5 + $0x4ec] ss:$44 sps:$4 sm:$0xff]  }
  0x52   :  { %1315 = vmatpush1.bf16.msra.mxu0 %v1981_v43  ;;  %v1639_v43 = vsel %vm1637_vm2, 1, %v2261_v8 }
  0x53   :  { %1316 = vmatprep.subr.bf16.mxu0 %v1989_v46  ;;  %1274 = vmatpush1.bf16.msra.mxu1 %v1990_v48  ;;  %v1653_v46 = vsel %vm1651_vm6, 1, %v2261_v8  ;;  %v2042_v48 = vld [vmem:[#allocation5 + $0x120] ss:$44 sps:$4 sm:$0xff]  }
  0x54   :  { %1275 = vmatprep.subr.bf16.mxu1 %v1991_v49  ;;  %v1597_v49 = vsel %vm1595_vm3, 1, %v2261_v8 }
  0x55   :  { %1586 = vperm.xlu0 %1922, %v1583_v35   ;;  %1589 = vperm.xlu1 %1923, %v1584_v36   ;;  %v2116_v35 = vld [vmem:[#allocation5 + $0x544] ss:$44 sps:$4 sm:$0xff]  }
  0x56   :  { %1317 = vmatpush1.bf16.msra.mxu0 %v1987_v47  ;;  %v2039_v47 = vld [vmem:[#allocation5 + $0x118] ss:$44 sps:$4 sm:$0xff]  }
  0x57   :  { %1318 = vmatprep.subr.bf16.mxu0 %v1995_v50  ;;  %1276 = vmatpush1.bf16.msra.mxu1 %v1996_v51  ;;  %v1598_v50 = vsel %vm1596_vm4, 1, %v2261_v8  ;;  %v2047_v51 = vld [vmem:[#allocation5 + $0x174] ss:$44 sps:$4 sm:$0xff]   ;;  %v2111_v36 = vld [vmem:[#allocation5 + $0x538] ss:$44 sps:$4 sm:$0xff]  }
  0x58   :  { %1277 = vmatprep.subr.bf16.mxu1 %v1997_v53  ;;  %v2045_v53 = vld [vmem:[#allocation5 + $0x170] ss:$44 sps:$4 sm:$0xff]  }
  0x59   :  { %1600 = vperm.xlu0 %1922, %v1597_v49   ;;  %1603 = vperm.xlu1 %1923, %v1598_v50   ;;  %v2131_v49 = vld [vmem:[#allocation5 + $0xd8] ss:$44 sps:$4 sm:$0xff]  }
  0x5a   :  { %1319 = vmatpush1.bf16.msra.mxu0 %v1993_v52  ;;  %v2050_v52 = vld [vmem:[#allocation5 + $0x17c] ss:$44 sps:$4 sm:$0xff]   ;;  %v2134_v50 = vld [vmem:[#allocation5 + $0x12c] ss:$44 sps:$4 sm:$0xff]  }
  0x5b   :  { %1320 = vmatprep.subr.bf16.mxu0 %v2001_v54  ;;  %1278 = vmatpush1.bf16.msra.mxu1 %v2002_v55  ;;  %v2048_v54 = vld [vmem:[#allocation5 + $0x178] ss:$44 sps:$4 sm:$0xff]   ;;  %v1612_v55 = vsel %vm1610_vm7, 1, %v2261_v8 }
  0x5c   :  { %1279 = vmatprep.subr.bf16.mxu1 %v2003_v57  ;;  %v2056_v57 = vld [vmem:[#allocation5 + $0x1d4] ss:$44 sps:$4 sm:$0xff]   ;;  %v2072_v8 = vld [vmem:[#allocation5 + $0x2d8] ss:$44 sps:$4 sm:$0xff]  }
  0x5d   :  { %1614 = vperm.xlu0 %1922, %v1611_v37   ;;  %1617 = vperm.xlu1 %1923, %v1612_v55   ;;  %v2114_v37 = vld [vmem:[#allocation5 + $0x540] ss:$44 sps:$4 sm:$0xff]   ;;  %v2140_v55 = vld [vmem:[#allocation5 + $0x448] ss:$44 sps:$4 sm:$0xff]  }
  0x5e   :  { %1321 = vmatpush1.bf16.msra.mxu0 %v1999_v56  ;;  %v2053_v56 = vld [vmem:[#allocation5 + $0x1cc] ss:$44 sps:$4 sm:$0xff]  }
  0x5f   :  { %1322 = vmatprep.subr.bf16.mxu0 %v2007_v58  ;;  %1280 = vmatpush1.bf16.msra.mxu1 %v2008_v59  ;;  %v2051_v58 = vld [vmem:[#allocation5 + $0x1c8] ss:$44 sps:$4 sm:$0xff]   ;;  %v2054_v59 = vld [vmem:[#allocation5 + $0x1d0] ss:$44 sps:$4 sm:$0xff]  }
  0x60   :  { %1281 = vmatprep.subr.bf16.mxu1 %v2009_v61  ;;  %v2062_v61 = vld [vmem:[#allocation5 + $0x22c] ss:$44 sps:$4 sm:$0xff]  }
  0x61   :  { %1631 = vperm.xlu1 %1923, %v1626_v40   ;;  %1628 = vperm.xlu0 %1922, %v1625_v41   ;;  %v2117_v40 = vld [vmem:[#allocation5 + $0x20] ss:$44 sps:$4 sm:$0xff]   ;;  %v2121_v41 = vld [vmem:[#allocation5 + $0x28] ss:$44 sps:$4 sm:$0xff]  }
  0x62   :  { %1323 = vmatpush1.bf16.msra.mxu0 %v2005_v60  ;;  %v2059_v60 = vld [vmem:[#allocation5 + $0x224] ss:$44 sps:$4 sm:$0xff]  }
  0x63   :  { %1324 = vmatprep.subr.bf16.mxu0 %v2013_v62  ;;  %1282 = vmatpush1.bf16.msra.mxu1 %v2014_v63  ;;  %v2057_v62 = vld [vmem:[#allocation5 + $0x220] ss:$44 sps:$4 sm:$0xff]   ;;  %v2060_v63 = vld [vmem:[#allocation5 + $0x228] ss:$44 sps:$4 sm:$0xff]  }
  0x64   :  { %1283 = vmatprep.subr.bf16.mxu1 %v2015_v1  ;;  %v2068_v1 = vld [vmem:[#allocation5 + $0x284] ss:$44 sps:$4 sm:$0xff]  }
  0x65   :  { %1645 = vperm.xlu1 %1923, %v1640_v42   ;;  %1642 = vperm.xlu0 %1922, %v1639_v43   ;;  %v2124_v42 = vld [vmem:[#allocation5 + $0x7c] ss:$44 sps:$4 sm:$0xff]   ;;  %v2125_v43 = vld [vmem:[#allocation5 + $0x340] ss:$44 sps:$4 sm:$0xff]  }
  0x66   :  { %1325 = vmatpush1.bf16.msra.mxu0 %v2011_v0  ;;  %v2065_v0 = vld [vmem:[#allocation5 + $0x27c] ss:$44 sps:$4 sm:$0xff]  }
  0x67   :  { %1326 = vmatprep.subr.bf16.mxu0 %v2019_v2  ;;  %1284 = vmatpush1.bf16.msra.mxu1 %v2020_v5  ;;  %v2063_v2 = vld [vmem:[#allocation5 + $0x278] ss:$44 sps:$4 sm:$0xff]   ;;  %v2071_v5 = vld [vmem:[#allocation5 + $0x2d4] ss:$44 sps:$4 sm:$0xff]  }
  0x68   :  { %1339 = vmatprep.subr.bf16.mxu1 %v2023_v6  ;;  %v2074_v6 = vld [vmem:[#allocation5 + $0x2dc] ss:$44 sps:$4 sm:$0xff]  }
  0x69   :  { %1659 = vperm.xlu1 %1923, %v1654_v45   ;;  %1656 = vperm.xlu0 %1922, %v1653_v46   ;;  %v2126_v45 = vld [vmem:[#allocation5 + $0x80] ss:$44 sps:$4 sm:$0xff]  }
  0x6a   :  { %1327 = vmatpush1.bf16.msra.mxu0 %v2017_v4  ;;  %v2066_v4 = vld [vmem:[#allocation5 + $0x280] ss:$44 sps:$4 sm:$0xff]  }
  0x6b   :  { %1382 = vmatprep.subr.bf16.mxu0 %v2026_v7  ;;  %v2069_v7 = vld [vmem:[#allocation5 + $0x2d0] ss:$44 sps:$4 sm:$0xff]   ;;  %v2129_v46 = vld [vmem:[#allocation5 + $0xd4] ss:$44 sps:$4 sm:$0xff]  }
 0x100   :  { %v98_v19 = vpop.f32.mrb[0].mxu0 }
 0x101   :  { %v1910_v20 = vpop.f32.mrb[1].mxu0 }
 0x102   :  { %v101_v21 = vpop.f32.mrb[2].mxu0  ;;  %v2090_v20 = vld [vmem:[#allocation5 + $0x3e0] ss:$44 sps:$4 sm:$0xff]  }
 0x103   :  { %v2359_v24 = vpack.c.bf16 %v101_v21, %v98_v19  ;;  %v1911_v25 = vpop.f32.mrb[3].mxu0  ;;  %v2087_v19 = vld [vmem:[#allocation5 + $0x3d8] ss:$44 sps:$4 sm:$0xff]   ;;  %v2095_v21 = vld [vmem:[#allocation5 + $0x434] ss:$44 sps:$4 sm:$0xff]  }
 0x104   :  { %v2096_v25 = vld [vmem:[#allocation5 + $0x438] ss:$44 sps:$4 sm:$0xff]  }
 0x105   :  { %1286 = vmatmul.mubr.bf16.vlgmr.msra.gmra.mrb[0].mxu1 %v2359_v24  ;;  %1329 = vmatmul.mubr.bf16.vlgmr.msra.gmra.mrb[4].mxu0 %v2359_v24 }
 0x106   :  { %1340 = vmatpush1.bf16.msra.mxu1 %v2021_v22  ;;  %1383 = vmatpush1.bf16.msra.mxu0 %v2024_v23  ;;  %v2098_v22 = vld [vmem:[#allocation5 + $0x43c] ss:$44 sps:$4 sm:$0xff]  }
 0x107   :  { %1341 = vmatprep.subr.bf16.mxu1 %v2029_v26  ;;  %1384 = vmatprep.subr.bf16.mxu0 %v2032_v27  ;;  %v2093_v23 = vld [vmem:[#allocation5 + $0x430] ss:$44 sps:$4 sm:$0xff]   ;;  %v2101_v26 = vld [vmem:[#allocation5 + $0x48c] ss:$44 sps:$4 sm:$0xff]   ;;  %v2104_v27 = vld [vmem:[#allocation5 + $0x494] ss:$44 sps:$4 sm:$0xff]  }
 0x108   :  { %1371 = vmatprep.mubr.bf16.mxu1 %v2326_v3  ;;  %1414 = vmatprep.mubr.bf16.mxu0 %v2326_v3 }
 0x10a   :  { %1342 = vmatpush1.bf16.msra.mxu1 %v2027_v28  ;;  %1385 = vmatpush1.bf16.msra.mxu0 %v2030_v29  ;;  %v2099_v28 = vld [vmem:[#allocation5 + $0x488] ss:$44 sps:$4 sm:$0xff]   ;;  %v2102_v29 = vld [vmem:[#allocation5 + $0x490] ss:$44 sps:$4 sm:$0xff]  }
 0x10b   :  { %1343 = vmatprep.subr.bf16.mxu1 %v2035_v32  ;;  %1386 = vmatprep.subr.bf16.mxu0 %v2038_v33  ;;  %v2105_v32 = vld [vmem:[#allocation5 + $0x4e0] ss:$44 sps:$4 sm:$0xff]   ;;  %v2108_v33 = vld [vmem:[#allocation5 + $0x4e8] ss:$44 sps:$4 sm:$0xff]  }
 0x10e   :  { %1344 = vmatpush1.bf16.msra.mxu1 %v2033_v34  ;;  %1387 = vmatpush1.bf16.msra.mxu0 %v2036_v38  ;;  %v2113_v34 = vld [vmem:[#allocation5 + $0x53c] ss:$44 sps:$4 sm:$0xff]   ;;  %v2119_v38 = vld [vmem:[#allocation5 + $0x24] ss:$44 sps:$4 sm:$0xff]  }
 0x10f   :  { %1345 = vmatprep.subr.bf16.mxu1 %v2041_v39  ;;  %1388 = vmatprep.subr.bf16.mxu0 %v2044_v44  ;;  %v2120_v39 = vld [vmem:[#allocation5 + $0x2e8] ss:$44 sps:$4 sm:$0xff]   ;;  %v2122_v44 = vld [vmem:[#allocation5 + $0x78] ss:$44 sps:$4 sm:$0xff]  }
 0x112   :  { %1346 = vmatpush1.bf16.msra.mxu1 %v2039_v47  ;;  %1389 = vmatpush1.bf16.msra.mxu0 %v2042_v48  ;;  %v2130_v47 = vld [vmem:[#allocation5 + $0x398] ss:$44 sps:$4 sm:$0xff]   ;;  %v2127_v48 = vld [vmem:[#allocation5 + $0xd0] ss:$44 sps:$4 sm:$0xff]  }
 0x113   :  { %1347 = vmatprep.subr.bf16.mxu1 %v2047_v51  ;;  %1390 = vmatprep.subr.bf16.mxu0 %v2050_v52  ;;  %v2135_v51 = vld [vmem:[#allocation5 + $0x3f0] ss:$44 sps:$4 sm:$0xff]   ;;  %v2132_v52 = vld [vmem:[#allocation5 + $0x128] ss:$44 sps:$4 sm:$0xff]  }
 0x116   :  { %1348 = vmatpush1.bf16.msra.mxu1 %v2045_v53  ;;  %1391 = vmatpush1.bf16.msra.mxu0 %v2048_v54  ;;  %v2136_v53 = vld [vmem:[#allocation5 + $0x130] ss:$44 sps:$4 sm:$0xff]  }
 0x117   :  { %1349 = vmatprep.subr.bf16.mxu1 %v2053_v56  ;;  %1392 = vmatprep.subr.bf16.mxu0 %v2056_v57  ;;  %v2139_v54 = vld [vmem:[#allocation5 + $0x184] ss:$44 sps:$4 sm:$0xff]   ;;  %v2137_v56 = vld [vmem:[#allocation5 + $0x180] ss:$44 sps:$4 sm:$0xff]   ;;  %v2144_v57 = vld [vmem:[#allocation5 + $0x1dc] ss:$44 sps:$4 sm:$0xff]  }
 0x11a   :  { %1350 = vmatpush1.bf16.msra.mxu1 %v2051_v58  ;;  %1393 = vmatpush1.bf16.msra.mxu0 %v2054_v59  ;;  %v2145_v58 = vld [vmem:[#allocation5 + $0x4a0] ss:$44 sps:$4 sm:$0xff]   ;;  %v2142_v59 = vld [vmem:[#allocation5 + $0x1d8] ss:$44 sps:$4 sm:$0xff]  }
 0x11b   :  { %1351 = vmatprep.subr.bf16.mxu1 %v2059_v60  ;;  %1394 = vmatprep.subr.bf16.mxu0 %v2062_v61  ;;  %v2146_v60 = vld [vmem:[#allocation5 + $0x1e0] ss:$44 sps:$4 sm:$0xff]  }
 0x11c   :  { %v2149_v61 = vld [vmem:[#allocation5 + $0x234] ss:$44 sps:$4 sm:$0xff]  }
 0x11e   :  { %1352 = vmatpush1.bf16.msra.mxu1 %v2057_v62  ;;  %1395 = vmatpush1.bf16.msra.mxu0 %v2060_v63  ;;  %v2150_v62 = vld [vmem:[#allocation5 + $0x4f8] ss:$44 sps:$4 sm:$0xff]   ;;  %v2147_v63 = vld [vmem:[#allocation5 + $0x230] ss:$44 sps:$4 sm:$0xff]  }
 0x11f   :  { %1353 = vmatprep.subr.bf16.mxu1 %v2065_v0  ;;  %1396 = vmatprep.subr.bf16.mxu0 %v2068_v1  ;;  %v2151_v0 = vld [vmem:[#allocation5 + $0x238] ss:$44 sps:$4 sm:$0xff]  }
 0x120   :  { %v2154_v1 = vld [vmem:[#allocation5 + $0x28c] ss:$44 sps:$4 sm:$0xff]  }
 0x122   :  { %1354 = vmatpush1.bf16.msra.mxu1 %v2063_v2  ;;  %1397 = vmatpush1.bf16.msra.mxu0 %v2066_v4  ;;  %v2155_v2 = vld [vmem:[#allocation5 + $0x550] ss:$44 sps:$4 sm:$0xff]   ;;  %v2152_v4 = vld [vmem:[#allocation5 + $0x288] ss:$44 sps:$4 sm:$0xff]  }
 0x123   :  { %1355 = vmatprep.subr.bf16.mxu1 %v2071_v5  ;;  %1398 = vmatprep.subr.bf16.mxu0 %v2074_v6  ;;  %v2156_v5 = vld [vmem:[#allocation5 + $0x290] ss:$44 sps:$4 sm:$0xff]  }
 0x124   :  { %v2159_v6 = vld [vmem:[#allocation5 + $0x2e4] ss:$44 sps:$4 sm:$0xff]  }
 0x126   :  { %1356 = vmatpush1.bf16.msra.mxu1 %v2069_v7  ;;  %1399 = vmatpush1.bf16.msra.mxu0 %v2072_v8  ;;  %v2157_v7 = vld [vmem:[#allocation5 + $0x2e0] ss:$44 sps:$4 sm:$0xff]   ;;  %v2162_v8 = vld [vmem:[#allocation5 + $0x33c] ss:$44 sps:$4 sm:$0xff]  }
 0x127   :  { %1357 = vmatprep.subr.bf16.mxu1 %v2077_v9  ;;  %1400 = vmatprep.subr.bf16.mxu0 %v2080_v10  ;;  %v2160_v9 = vld [vmem:[#allocation5 + $0x338] ss:$44 sps:$4 sm:$0xff]   ;;  %v2165_v10 = vld [vmem:[#allocation5 + $0x394] ss:$44 sps:$4 sm:$0xff]  }
 0x12a   :  { %1358 = vmatpush1.bf16.msra.mxu1 %v2075_v11  ;;  %1401 = vmatpush1.bf16.msra.mxu0 %v2078_v12  ;;  %v2163_v11 = vld [vmem:[#allocation5 + $0x390] ss:$44 sps:$4 sm:$0xff]   ;;  %v2168_v12 = vld [vmem:[#allocation5 + $0x3ec] ss:$44 sps:$4 sm:$0xff]  }
 0x12b   :  { %1359 = vmatprep.subr.bf16.mxu1 %v2083_v13  ;;  %1402 = vmatprep.subr.bf16.mxu0 %v2086_v14  ;;  %v2166_v13 = vld [vmem:[#allocation5 + $0x3e8] ss:$44 sps:$4 sm:$0xff]   ;;  %v2171_v14 = vld [vmem:[#allocation5 + $0x444] ss:$44 sps:$4 sm:$0xff]  }
 0x12e   :  { %1360 = vmatpush1.bf16.msra.mxu1 %v2081_v15  ;;  %1403 = vmatpush1.bf16.msra.mxu0 %v2084_v16  ;;  %v2169_v15 = vld [vmem:[#allocation5 + $0x440] ss:$44 sps:$4 sm:$0xff]   ;;  %v2174_v16 = vld [vmem:[#allocation5 + $0x49c] ss:$44 sps:$4 sm:$0xff]  }
 0x12f   :  { %1361 = vmatprep.subr.bf16.mxu1 %v2089_v17  ;;  %1404 = vmatprep.subr.bf16.mxu0 %v2092_v18  ;;  %v2172_v17 = vld [vmem:[#allocation5 + $0x498] ss:$44 sps:$4 sm:$0xff]   ;;  %v2177_v18 = vld [vmem:[#allocation5 + $0x4f4] ss:$44 sps:$4 sm:$0xff]  }
 0x132   :  { %1362 = vmatpush1.bf16.msra.mxu1 %v2087_v19  ;;  %1405 = vmatpush1.bf16.msra.mxu0 %v2090_v20  ;;  %v2175_v19 = vld [vmem:[#allocation5 + $0x4f0] ss:$44 sps:$4 sm:$0xff]   ;;  %v2180_v20 = vld [vmem:[#allocation5 + $0x54c] ss:$44 sps:$4 sm:$0xff]  }
 0x133   :  { %1363 = vmatprep.subr.bf16.mxu1 %v2095_v21  ;;  %1406 = vmatprep.subr.bf16.mxu0 %v2098_v22  ;;  %v2178_v21 = vld [vmem:[#allocation5 + $0x548] ss:$44 sps:$4 sm:$0xff]   ;;  %v1517_v22 = vpop.permute.xlu0 %1516 }
 0x134   :  { %vm1521_vm8 = vcmp.eq.s32.totalorder %v1517_v22, 1 }
 0x136   :  { %1364 = vmatpush1.bf16.msra.mxu1 %v2093_v23  ;;  %1407 = vmatpush1.bf16.msra.mxu0 %v2096_v25  ;;  %v1531_v23 = vpop.permute.xlu1 %1530  ;;  %v302_v25 = vlaneseq }
 0x137   :  { %1365 = vmatprep.subr.bf16.mxu1 %v2101_v26  ;;  %1408 = vmatprep.subr.bf16.mxu0 %v2104_v27  ;;  %v1520_v26 = vpop.permute.xlu0 %1519  ;;  %vm1535_vm9 = vcmp.eq.s32.totalorder %v1531_v23, 1 }
 0x138   :  { %vm1522_vm10 = vcmp.eq.s32.totalorder %v1520_v26, 1 }
 0x13a   :  { %1366 = vmatpush1.bf16.msra.mxu1 %v2099_v28  ;;  %1409 = vmatpush1.bf16.msra.mxu0 %v2102_v29  ;;  %v1534_v27 = vpop.permute.xlu1 %1533  ;;  %v2403_v28 = vshrl.u32 %v302_v25, 7 }
 0x13b   :  { %1367 = vmatprep.subr.bf16.mxu1 %v2107_v30  ;;  %1410 = vmatprep.subr.bf16.mxu0 %v2110_v31  ;;  %v1545_v29 = vpop.permute.xlu0 %1544  ;;  %vm1536_vm11 = vcmp.eq.s32.totalorder %v1534_v27, 1 }
 0x13c   :  { %v304_v30 = vsub.s32 0, %v2403_v28  ;;  %vm1549_vm12 = vcmp.eq.s32.totalorder %v1545_v29, 1 }
 0x13e   :  { %1368 = vmatpush1.bf16.msra.mxu1 %v2105_v32  ;;  %1411 = vmatpush1.bf16.msra.mxu0 %v2108_v33  ;;  %v1548_v31 = vpop.permute.xlu1 %1547  ;;  %v298_v32 = vld [vmem:[%s2458_s4] sm:$0xff]  ;;  %v308_v33 = vsub.s32 1, %v2403_v28 }
 0x13f   :  { %1369 = vmatprep.subr.bf16.mxu1 %v2113_v34  ;;  %1412 = vmatprep.subr.bf16.mxu0 %v2116_v35  ;;  %v312_v34 = vsub.s32 2, %v2403_v28  ;;  %v305_v35 = vrot.slane %v298_v32, %v304_v30  ;;  %vm1550_vm14 = vcmp.eq.s32.totalorder %v1548_v31, 1 }
 0x142   :  { %1370 = vmatpush1.bf16.msra.mxu1 %v2111_v36  ;;  %1413 = vmatpush1.bf16.msra.mxu0 %v2114_v37  ;;  %v309_v36 = vrot.slane %v298_v32, %v308_v33  ;;  %v313_v37 = vrot.slane %v298_v32, %v312_v34 }
 0x143   :  { %1425 = vmatprep.subr.bf16.mxu1 %v2119_v38  ;;  %1884 = vmatprep.subr.bf16.mxu0 %v2120_v39  ;;  %v1559_v38 = vpop.permute.xlu0 %1558  ;;  %v1562_v39 = vpop.permute.xlu1 %1561 }
 0x144   :  { %vm1563_vm13 = vcmp.eq.s32.totalorder %v1559_v38, 1  ;;  %vm1564_vm15 = vcmp.eq.s32.totalorder %v1562_v39, 1 }
 0x145   :  { %1372 = vmatmul.mubr.bf16.vlgmr.msra.gmra.mrb[4].mxu1 %v2359_v24  ;;  %1415 = vmatmul.mubr.bf16.vlgmr.msra.gmra.mrb[8].mxu0 %v2359_v24 }
 0x146   :  { %1426 = vmatpush1.bf16.msra.mxu1 %v2117_v40  ;;  %1885 = vmatpush3.bf16.msra.mxu0 %v2121_v41 }
 0x147   :  { %1427 = vmatprep.subr.bf16.mxu1 %v2124_v42  ;;  %1886 = vmatprep.subr.bf16.mxu0 %v2125_v43 }
 0x148   :  { %1500 = vmatprep.mubr.bf16.mxu0 %v2326_v3  ;;  %1457 = vmatprep.mubr.bf16.mxu1 %v2326_v3  ;;  %v2141_v3 = vld [vmem:[#allocation5 + $0x188] ss:$44 sps:$4 sm:$0xff]  }
 0x14a   :  { %1428 = vmatpush1.bf16.msra.mxu1 %v2122_v44  ;;  %1887 = vmatpush3.bf16.msra.mxu0 %v2126_v45 }
 0x14b   :  { %1429 = vmatprep.subr.bf16.mxu1 %v2129_v46  ;;  %1888 = vmatprep.subr.bf16.mxu0 %v2130_v47 }
 0x14e   :  { %1430 = vmatpush1.bf16.msra.mxu1 %v2127_v48  ;;  %1889 = vmatpush3.bf16.msra.mxu0 %v2131_v49 }
 0x14f   :  { %1431 = vmatprep.subr.bf16.mxu1 %v2134_v50  ;;  %1890 = vmatprep.subr.bf16.mxu0 %v2135_v51 }
 0x152   :  { %1432 = vmatpush1.bf16.msra.mxu1 %v2132_v52  ;;  %1891 = vmatpush3.bf16.msra.mxu0 %v2136_v53 }
 0x153   :  { %1433 = vmatprep.subr.bf16.mxu1 %v2139_v54  ;;  %1892 = vmatprep.subr.bf16.mxu0 %v2140_v55 }
 0x156   :  { %1434 = vmatpush1.bf16.msra.mxu1 %v2137_v56  ;;  %1893 = vmatpush3.bf16.msra.mxu0 %v2141_v3 }
 0x157   :  { %1435 = vmatprep.subr.bf16.mxu1 %v2144_v57  ;;  %1894 = vmatprep.subr.bf16.mxu0 %v2145_v58 }
 0x15a   :  { %1436 = vmatpush1.bf16.msra.mxu1 %v2142_v59  ;;  %1895 = vmatpush3.bf16.msra.mxu0 %v2146_v60 }
 0x15b   :  { %1437 = vmatprep.subr.bf16.mxu1 %v2149_v61  ;;  %1896 = vmatprep.subr.bf16.mxu0 %v2150_v62 }
 0x15e   :  { %1438 = vmatpush1.bf16.msra.mxu1 %v2147_v63  ;;  %1897 = vmatpush3.bf16.msra.mxu0 %v2151_v0  ;;  %v1573_v0 = vpop.permute.xlu0 %1572 }
 0x15f   :  { %1439 = vmatprep.subr.bf16.mxu1 %v2154_v1  ;;  %1898 = vmatprep.subr.bf16.mxu0 %v2155_v2  ;;  %v1576_v1 = vpop.permute.xlu1 %1575  ;;  %vm1577_vm0 = vcmp.eq.s32.totalorder %v1573_v0, 1 }
 0x160   :  { %vm1578_vm2 = vcmp.eq.s32.totalorder %v1576_v1, 1 }
 0x162   :  { %1440 = vmatpush1.bf16.msra.mxu1 %v2152_v4  ;;  %1899 = vmatpush3.bf16.msra.mxu0 %v2156_v5  ;;  %v1587_v2 = vpop.permute.xlu0 %1586 }
 0x163   :  { %1441 = vmatprep.subr.bf16.mxu1 %v2159_v6  ;;  %v1590_v4 = vpop.permute.xlu1 %1589  ;;  %v320_v6 = vsub.s32 4, %v2403_v28  ;;  %vm1591_vm1 = vcmp.eq.s32.totalorder %v1587_v2, 1 }
 0x164   :  { %vm1592_vm3 = vcmp.eq.s32.totalorder %v1590_v4, 1 }
 0x165   :  { %1501 = vmatmul.mubr.bf16.vlgmr.msra.gmra.mrb[12].mxu0 %v2359_v24 }
 0x166   :  { %1442 = vmatpush1.bf16.msra.mxu1 %v2157_v7  ;;  %v1601_v5 = vpop.permute.xlu0 %1600 }
 0x167   :  { %1443 = vmatprep.subr.bf16.mxu1 %v2162_v8  ;;  %v1604_v7 = vpop.permute.xlu1 %1603  ;;  %v324_v8 = vsub.s32 5, %v2403_v28  ;;  %vm1605_vm4 = vcmp.eq.s32.totalorder %v1601_v5, 1 }
 0x168   :  { %vm1606_vm6 = vcmp.eq.s32.totalorder %v1604_v7, 1 }
 0x16a   :  { %1444 = vmatpush1.bf16.msra.mxu1 %v2160_v9  ;;  %v328_v9 = vsub.s32 6, %v2403_v28 }
 0x16b   :  { %1445 = vmatprep.subr.bf16.mxu1 %v2165_v10  ;;  %v332_v10 = vsub.s32 7, %v2403_v28 }
 0x16e   :  { %1446 = vmatpush1.bf16.msra.mxu1 %v2163_v11  ;;  %v321_v11 = vrot.slane %v298_v32, %v320_v6 }
 0x16f   :  { %1447 = vmatprep.subr.bf16.mxu1 %v2168_v12  ;;  %v325_v12 = vrot.slane %v298_v32, %v324_v8 }
 0x172   :  { %1448 = vmatpush1.bf16.msra.mxu1 %v2166_v13  ;;  %v329_v13 = vrot.slane %v298_v32, %v328_v9 }
 0x173   :  { %1449 = vmatprep.subr.bf16.mxu1 %v2171_v14  ;;  %v1615_v14 = vpop.permute.xlu0 %1614 }
 0x174   :  { %vm1619_vm5 = vcmp.eq.s32.totalorder %v1615_v14, 1 }
 0x176   :  { %1450 = vmatpush1.bf16.msra.mxu1 %v2169_v15  ;;  %v1618_v15 = vpop.permute.xlu1 %1617 }
 0x177   :  { %1451 = vmatprep.subr.bf16.mxu1 %v2174_v16  ;;  %vm1620_vm7 = vcmp.eq.s32.totalorder %v1618_v15, 1 }
 0x17a   :  { %1452 = vmatpush1.bf16.msra.mxu1 %v2172_v17 }
 0x17b   :  { %1453 = vmatprep.subr.bf16.mxu1 %v2177_v18  ;;  %v333_v18 = vrot.slane %v298_v32, %v332_v10 }
 0x17e   :  { %1454 = vmatpush1.bf16.msra.mxu1 %v2175_v19 }
 0x17f   :  { %1455 = vmatprep.subr.bf16.mxu1 %v2180_v20 }
 0x182   :  { %1456 = vmatpush1.bf16.msra.mxu1 %v2178_v21 }
 0x185   :  { %1458 = vmatmul.mubr.bf16.vlgmr.msra.gmra.mrb[8].mxu1 %v2359_v24  ;;  %v316_v24 = vsub.s32 3, %v2403_v28 }
 0x187   :  { %v317_v42 = vrot.slane %v298_v32, %v316_v24 }
 0x1d8   :  { %v1287_v40 = vpop.f32.mrb[0].mxu1  ;;  %v1330_v41 = vpop.f32.mrb[4].mxu0 }
 0x1d9   :  { %v1288_v43 = vadd.f32 %v1287_v40, %v305_v35  ;;  %v1289_v44 = vpop.f32.mrb[1].mxu1  ;;  %v1332_v45 = vpop.f32.mrb[5].mxu0  ;;  %v1331_v50 = vadd.f32 %v1330_v41, %v313_v37 }
 0x1da   :  { %v1290_v46 = vadd.f32 %v1289_v44, %v309_v36  ;;  %v1291_v47 = vpop.f32.mrb[2].mxu1  ;;  %v1334_v48 = vpop.f32.mrb[6].mxu0  ;;  %v1333_v55 = vadd.f32 %v1332_v45, %v317_v42 }
 0x1db   :  { %v1523_v49 = vsel %vm1521_vm8, %v1288_v43, 0.0  ;;  %v1292_v51 = vadd.f32 %v1291_v47, %v305_v35  ;;  %v1293_v52 = vpop.f32.mrb[3].mxu1  ;;  %v1336_v53 = vpop.f32.mrb[7].mxu0  ;;  %v1335_v57 = vadd.f32 %v1334_v48, %v313_v37 }
 0x1dc   :  { %v1537_v54 = vsel %vm1535_vm9, %v1290_v46, %v1523_v49  ;;  %v1294_v56 = vadd.f32 %v1293_v52, %v309_v36  ;;  %v1337_v60 = vadd.f32 %v1336_v53, %v317_v42  ;;  %v1632_v52 = vpop.permute.xlu1 %1631 }
 0x1dd   :  { %v1524_v3 = vsel %vm1522_vm10, %v1292_v51, 0.0  ;;  %v1551_v58 = vsel %vm1549_vm12, %v1331_v50, %v1537_v54  ;;  %v1629_v51 = vpop.permute.xlu0 %1628  ;;  %v299_v54 = vld [vmem:[%s2458_s4 + $0x8] sm:$0x7]  ;;  %vm1634_vm10 = vcmp.eq.s32.totalorder %v1632_v52, 1  ;;  %s2262_s4 = smov [#allocation7]  }
 0x1de   :  { %v1538_v59 = vsel %vm1536_vm11, %v1294_v56, %v1524_v3  ;;  %v1565_v61 = vsel %vm1563_vm13, %v1333_v55, %v1551_v58  ;;  %v337_v56 = vrot.slane %v299_v54, %v304_v30  ;;  %v341_v3 = vrot.slane %v299_v54, %v308_v33  ;;  %s1682_s6 = sshll.u32 %s2262_s4, 4  ;;  %s1683_s6 = int_to_ptr.vmem [resolvable:$true] %s1682_s6 }
 0x1df   :  { %v1552_v62 = vsel %vm1550_vm14, %v1335_v57, %v1538_v59  ;;  %v345_v57 = vrot.slane %v299_v54, %v312_v34  ;;  %vm1633_vm8 = vcmp.eq.s32.totalorder %v1629_v51, 1  ;;  %s2225_s7 = scalar_lea.vmem %s1683_s6, 128  ;;  %p2230_p3 = scmp.lt.s32.totalorder %s1683_s6, %s1683_s6 }
 0x1e0   :  { %v1566_v63 = vsel %vm1564_vm15, %v1337_v60, %v1552_v62  ;;  %v1646_v55 = vpop.permute.xlu1 %1645  ;;  %p2226_p2 = scmp.ne.s32.totalorder %s1683_s6, %s2225_s7  ;;  %p2231_p4 = scmp.lt.s32.totalorder %s2225_s7, %s2225_s7 }
 0x1e1   :  { %v1643_v53 = vpop.permute.xlu0 %1642  ;;  %vm1648_vm12 = vcmp.eq.s32.totalorder %v1646_v55, 1 }
 0x1e2   :  { %vm1647_vm9 = vcmp.eq.s32.totalorder %v1643_v53, 1  ;;  %p2232_p5 = por %p2231_p4, %p2230_p3 }
 0x1e4   :  { %v1660_v0 = vpop.permute.xlu1 %1659  ;;  %p2233_p6 = pnand %p2232_p5, %p2226_p2 }
 0x1e5   :  { %v1657_v59 = vpop.permute.xlu0 %1656  ;;  %vm1662_vm13 = vcmp.eq.s32.totalorder %v1660_v0, 1 }
 0x1e6   :  { %vm1661_vm11 = vcmp.eq.s32.totalorder %v1657_v59, 1 }
 0x218   :  { %v1373_v16 = vpop.f32.mrb[4].mxu1  ;;  %v1416_v17 = vpop.f32.mrb[8].mxu0 }
 0x219   :  { %v1374_v19 = vadd.f32 %v1373_v16, %v321_v11  ;;  %v1375_v20 = vpop.f32.mrb[5].mxu1  ;;  %v1418_v21 = vpop.f32.mrb[9].mxu0  ;;  %v1417_v27 = vadd.f32 %v1416_v17, %v329_v13 }
 0x21a   :  { %v1376_v22 = vadd.f32 %v1375_v20, %v325_v12  ;;  %v1377_v23 = vpop.f32.mrb[6].mxu1  ;;  %v1420_v25 = vpop.f32.mrb[10].mxu0  ;;  %v1419_v36 = vadd.f32 %v1418_v21, %v333_v18 }
 0x21b   :  { %v1579_v26 = vsel %vm1577_vm0, %v1374_v19, %v1565_v61  ;;  %v1378_v29 = vadd.f32 %v1377_v23, %v321_v11  ;;  %v1379_v31 = vpop.f32.mrb[7].mxu1  ;;  %v1422_v24 = vpop.f32.mrb[11].mxu0  ;;  %v1421_v38 = vadd.f32 %v1420_v25, %v329_v13 }
 0x21c   :  { %v1593_v35 = vsel %vm1591_vm1, %v1376_v22, %v1579_v26  ;;  %v1380_v32 = vadd.f32 %v1379_v31, %v325_v12  ;;  %v1423_v41 = vadd.f32 %v1422_v24, %v333_v18 }
 0x21d   :  { %v1580_v37 = vsel %vm1578_vm2, %v1378_v29, %v1566_v63  ;;  %v1607_v39 = vsel %vm1605_vm4, %v1417_v27, %v1593_v35 }
 0x21e   :  { %v1594_v40 = vsel %vm1592_vm3, %v1380_v32, %v1580_v37  ;;  %v1621_v42 = vsel %vm1619_vm5, %v1419_v36, %v1607_v39 }
 0x21f   :  { %v1608_v43 = vsel %vm1606_vm6, %v1421_v38, %v1594_v40 }
 0x220   :  { %v1622_v44 = vsel %vm1620_vm7, %v1423_v41, %v1608_v43 }
 0x238   :  { %v1900_v45 = vpop.f32.mrb[12].mxu0 }
 0x239   :  { %v1901_v46 = vpop.f32.mrb[13].mxu0 }
 0x23a   :  { %v1902_v47 = vadd.f32 %v1901_v46, %v1900_v45  ;;  %v1903_v48 = vpop.f32.mrb[14].mxu0 }
 0x23b   :  { %v1904_v49 = vpop.f32.mrb[15].mxu0 }
 0x23c   :  { %v1905_v50 = vadd.f32 %v1904_v49, %v1903_v48  ;;  %v1503_v1 = vadd.f32 %v1902_v47, %v345_v57 }
 0x23e   :  { %v1506_v28 = vadd.f32 %v1905_v50, %v345_v57 }
 0x258   :  { %v1459_v58 = vpop.f32.mrb[8].mxu1 }
 0x259   :  { %v1460_v60 = vadd.f32 %v1459_v58, %v337_v56  ;;  %v1461_v61 = vpop.f32.mrb[9].mxu1 }
 0x25a   :  { %v1462_v62 = vadd.f32 %v1461_v61, %v341_v3  ;;  %v1463_v63 = vpop.f32.mrb[10].mxu1 }
 0x25b   :  { %v1635_v2 = vsel %vm1633_vm8, %v1460_v60, %v1621_v42  ;;  %v1464_v4 = vadd.f32 %v1463_v63, %v337_v56  ;;  %v1465_v5 = vpop.f32.mrb[11].mxu1 }
 0x25c   :  { %v1649_v30 = vsel %vm1647_vm9, %v1462_v62, %v1635_v2  ;;  %v1466_v33 = vadd.f32 %v1465_v5, %v341_v3 }
 0x25d   :  { %v1636_v34 = vsel %vm1634_vm10, %v1464_v4, %v1622_v44  ;;  %v1663_v6 = vsel %vm1661_vm11, %v1503_v1, %v1649_v30 }
 0x25e   :  { %v1650_v7 = vsel %vm1648_vm12, %v1466_v33, %v1636_v34  ;;  %v1665_v9 = vmax.f32 %v1663_v6, 0.0 }
 0x25f   :  { %v1664_v8 = vsel %vm1662_vm13, %v1506_v28, %v1650_v7 }
 0x260   :  { %v1666_v10 = vmax.f32 %v1664_v8, 0.0 }
 0x262   :  { %v1880_v11 = vpack.c.bf16 %v1666_v10, %v1665_v9 }
 0x264   :  { %1881 = vst [vmem:[#allocation7] sm:$0xff] %v1880_v11  }
 0x265   :  { %2236 = shalt.err (!%p2233_p6)
}
 0x266   :  { %s2237_s10 = scalar_lea.hbm %s2459_s5, 128 }
 0x267   :  { %p2238_p7 = scmp.ne.s32.totalorder %s2459_s5, %s2237_s10  ;;  %p2241_p8 = scmp.lt.u32.totalorder %s2237_s10, %s2459_s5 }
 0x269   :  { %p2243_p9 = pnand %p2241_p8, %p2238_p7 }
 0x26b   :  { %2246 = shalt.err (!%p2243_p9)
}
 0x26c   :  { %1688 = dma.vmem_to_hbm [thread:$0]  %s1683_s6, 128, %s2459_s5, [#allocation4], %s2254_s28, %s2254_s28, %s2255_s29  }
 0x26d   :  { %2251 = dma.done.wait [#allocation4], 128  }
 0x26e   :  { %2252 = vsyncadd [#allocation4], 4294967168 }
 0x26f   :  { %1692 = vsyncpa [#allocation3], 1 }
 0x270   :  { %1693 = vsyncpa [#allocation6], 1 }
 0x271   :  { %1694 = vsyncpa [#allocation4], 1 }

</bundles_post_ra>
